<compile_context>
chip_gen: v6e
topology: v6e:2x2x1
jax: 0.10.0
libtpu: 0.0.40
codegen_flags: <defaults>
</compile_context>

<pallas_src>
import functools

import jax
import jax.numpy as jnp
from jax.experimental import pallas as pl
from jax.experimental.pallas import tpu as pltpu

EPS = 1e-5


# ----------------------------------------------------------------------------
# Kernel
# ----------------------------------------------------------------------------
def mlp_decoder_kernel(x_ref, w1_ref, s1_ref, b1_ref, w2_ref, b2_ref,
                       w3_ref, b3_ref, w4_ref, b4_ref, o_ref, acc_ref,
                       *, x_resident, fc4_vpu):
    k = pl.program_id(0)

    @pl.when(k == 0)
    def _init():
        acc_ref[...] = jnp.zeros_like(acc_ref)

    # Streaming fc1: int8 w1 tile -> bf16 (exact; VPU slack since we are
    # DMA-bound) -> MXU matmul with f32 accumulation.  The per-column dequant
    # scale is applied once in the epilogue.
    xk = x_ref[k] if x_resident else x_ref[0]
    wk = w1_ref[...].astype(xk.dtype)
    acc_ref[...] += jnp.dot(xk, wk, preferred_element_type=jnp.float32)

    @pl.when(k == pl.num_programs(0) - 1)
    def _epilogue():
        w_dt = w2_ref.dtype
        # relu(fc1): apply int8 dequant scale + bias.  (b1 is NOT folded into
        # the accumulator init because that would require b1/s1, which blows up
        # for near-zero weight columns.)
        h = jnp.maximum(acc_ref[...] * s1_ref[...] + b1_ref[...], 0.0)
        # relu(bn1-folded fc2)
        h = jnp.maximum(
            jnp.dot(h.astype(w_dt), w2_ref[...],
                    preferred_element_type=jnp.float32) + b2_ref[...], 0.0)
        # relu(bn2-folded fc3)
        h = jnp.maximum(
            jnp.dot(h.astype(w_dt), w3_ref[...],
                    preferred_element_type=jnp.float32) + b3_ref[...], 0.0)
        # bn3-folded fc4
        if fc4_vpu:
            # binary == 1: VPU broadcast-mul + lane reduce instead of an MXU
            # push/drain producing a single output column.
            out = jnp.sum(h * w4_ref[...], axis=-1, keepdims=True) + b4_ref[...]
        else:
            out = jnp.dot(h.astype(w4_ref.dtype), w4_ref[...],
                          preferred_element_type=jnp.float32) + b4_ref[...]
        o_ref[...] = out.astype(o_ref.dtype)


# ----------------------------------------------------------------------------
# Parameter preparation (BN folding, int8 quant of w1, bf16 cast, K padding)
# ----------------------------------------------------------------------------
def _fold_bn_into_next_linear(w_next_t, b_next, gamma, beta, mean, var):
    """bn(h) = h*s + t; bn(h) @ W + b == h @ (s[:,None]*W) + (t @ W + b)."""
    s = gamma / jnp.sqrt(var + EPS)
    t = beta - mean * s
    return w_next_t * s[:, None], b_next + t @ w_next_t


def prepare_params(p, *, tk, weight_dtype=jnp.bfloat16, quantize_w1=True):
    """p holds torch-layout params: fc*_w (out,in), fc*_b (out,), bn*_{g,b,m,v} (c,)."""
    in_dim = p["fc1_w"].shape[1]
    binary = p["fc4_w"].shape[0]

    w1 = p["fc1_w"].T.astype(jnp.float32)          # (in, hidden)
    b1 = p["fc1_b"].astype(jnp.float32)
    w2, b2 = _fold_bn_into_next_linear(p["fc2_w"].T, p["fc2_b"],
                                       p["bn1_g"], p["bn1_b"], p["bn1_m"], p["bn1_v"])
    w3, b3 = _fold_bn_into_next_linear(p["fc3_w"].T, p["fc3_b"],
                                       p["bn2_g"], p["bn2_b"], p["bn2_m"], p["bn2_v"])
    w4, b4 = _fold_bn_into_next_linear(p["fc4_w"].T, p["fc4_b"],
                                       p["bn3_g"], p["bn3_b"], p["bn3_m"], p["bn3_v"])

    pad = (-in_dim) % tk                           # pad contraction dim to a TK multiple
    if pad:
        w1 = jnp.pad(w1, ((0, pad), (0, 0)))

    if quantize_w1:
        # Per-output-column symmetric int8; scale folded into the epilogue.
        amax = jnp.max(jnp.abs(w1), axis=0)
        s1 = jnp.where(amax > 0, amax, 1.0).astype(jnp.float32) / 127.0
        w1q = jnp.clip(jnp.round(w1 / s1[None, :]), -127.0, 127.0).astype(jnp.int8)
    else:
        s1 = jnp.ones((w1.shape[1],), jnp.float32)
        w1q = w1.astype(weight_dtype)

    prep = {
        "w1": w1q,
        "s1": s1.reshape(1, -1),
        "b1": b1.reshape(1, -1),
        "w2": w2.astype(weight_dtype),
        "b2": b2.reshape(1, -1).astype(jnp.float32),
        "w3": w3.astype(weight_dtype),
        "b3": b3.reshape(1, -1).astype(jnp.float32),
        "b4": b4.reshape(1, -1).astype(jnp.float32),
        "in_dim": in_dim,
        "tk": tk,
        "weight_dtype": weight_dtype,
        "fc4_vpu": binary == 1,
    }
    if prep["fc4_vpu"]:
        prep["w4"] = w4.T.astype(jnp.float32)      # (1, out) row for VPU reduce
    else:
        prep["w4"] = w4.astype(weight_dtype)       # (out, binary)
    return prep


# ----------------------------------------------------------------------------
# Wrapper
# ----------------------------------------------------------------------------
def _vmem_capacity_bytes():
    try:
        return int(pltpu.get_tpu_info().vmem_capacity_bytes)
    except Exception:
        return 64 << 20   # most conservative per-core physical VMEM (v7x)


def mlp_decoder(x, prep):
    """x: (B, in_dim) float32 -> (B, binary) float32."""
    B = x.shape[0]
    tk = prep["tk"]
    wd = prep["weight_dtype"]
    w1, w2, w3, w4 = prep["w1"], prep["w2"], prep["w3"], prep["w4"]
    s1, b1, b2, b3, b4 = prep["s1"], prep["b1"], prep["b2"], prep["b3"], prep["b4"]

    in_pad, hidden = w1.shape
    out_dim = w3.shape[1]
    binary = b4.shape[1]
    num_k = in_pad // tk

    pad = in_pad - x.shape[1]
    if pad:
        x = jnp.pad(x, ((0, 0), (0, pad)))
    # (num_k, B, tk): each K-tile is a contiguous slab (no strided B-row DMA);
    # small x is held fully resident and indexed inside the kernel.
    x = x.astype(wd).reshape(B, num_k, tk).transpose(1, 0, 2)

    act_itemsize = jnp.dtype(wd).itemsize
    x_bytes = x.size * act_itemsize
    x_resident = x_bytes <= (4 << 20)

    if x_resident:
        x_spec = pl.BlockSpec((num_k, B, tk), lambda k: (0, 0, 0))
        x_block_bytes = x_bytes
    else:
        x_spec = pl.BlockSpec((1, B, tk), lambda k: (k, 0, 0))
        x_block_bytes = B * tk * act_itemsize

    def nbytes(a):
        return a.size * a.dtype.itemsize

    w1_block_bytes = tk * hidden * w1.dtype.itemsize
    resident_bytes = sum(nbytes(a) for a in (s1, b1, w2, b2, w3, b3, w4, b4))
    out_block_bytes = B * binary * 4
    acc_bytes = B * hidden * 4

    # Honest VMEM budget: 2 pipeline buffers per BlockSpec'd operand (constant
    # index_maps are still double-buffered by default), single-buffered scratch
    # accumulator, ~25% slack + Mosaic internal scratch headroom; capped by the
    # physical per-core VMEM of the running chip.
    required = 2 * (x_block_bytes + w1_block_bytes + resident_bytes
                    + out_block_bytes) + acc_bytes
    vmem_limit = required + (required // 4) + (4 << 20)
    vmem_limit = int(max(16 << 20, min(vmem_limit, (_vmem_capacity_bytes() * 9) // 10)))

    flops = 2 * B * (in_pad * hidden + hidden * hidden
                     + hidden * out_dim + out_dim * binary)
    bytes_accessed = x_bytes + nbytes(w1) + resident_bytes + B * binary * 4

    kernel = functools.partial(mlp_decoder_kernel,
                               x_resident=x_resident,
                               fc4_vpu=prep["fc4_vpu"])

    grid_spec = pltpu.PrefetchScalarGridSpec(
        num_scalar_prefetch=0,
        grid=(num_k,),
        in_specs=[
            x_spec,                                              # x (resident or K-streamed)
            pl.BlockSpec((tk, hidden), lambda k: (k, 0)),        # w1: int8, streamed over K
            pl.BlockSpec((1, hidden), lambda k: (0, 0)),         # s1 dequant scale (resident)
            pl.BlockSpec((1, hidden), lambda k: (0, 0)),         # b1 (resident)
            pl.BlockSpec((hidden, hidden), lambda k: (0, 0)),    # w2 (resident)
            pl.BlockSpec((1, hidden), lambda k: (0, 0)),         # b2 (resident)
            pl.BlockSpec((hidden, out_dim), lambda k: (0, 0)),   # w3 (resident)
            pl.BlockSpec((1, out_dim), lambda k: (0, 0)),        # b3 (resident)
            pl.BlockSpec(w4.shape, lambda k: (0, 0)),            # w4 (resident)
            pl.BlockSpec((1, binary), lambda k: (0, 0)),         # b4 (resident)
        ],
        out_specs=pl.BlockSpec((B, binary), lambda k: (0, 0)),
        scratch_shapes=[pltpu.VMEM((B, hidden), jnp.float32)],   # fc1 accumulator
    )

    return pl.pallas_call(
        kernel,
        out_shape=jax.ShapeDtypeStruct((B, binary), jnp.float32),
        grid_spec=grid_spec,
        compiler_params=pltpu.CompilerParams(
            dimension_semantics=("arbitrary",),
            vmem_limit_bytes=vmem_limit),
        cost_estimate=pl.CostEstimate(flops=flops, transcendentals=0,
                                      bytes_accessed=bytes_accessed),
    )(x, w1, s1, b1, w2, b2, w3, b3, w4, b4)


# ----------------------------------------------------------------------------
# Init + references
# ----------------------------------------------------------------------------
def init_params(key, in_dim, hidden_dim, out_dim, binary):
    keys = iter(jax.random.split(key, 24))

    def lin(fan_in, fan_out):
        w = 0.02 * jax.random.normal(next(keys), (fan_out, fan_in), jnp.float32)
        b = 0.01 * jax.random.normal(next(keys), (fan_out,), jnp.float32)
        return w, b

    def bn(c):
        g = 1.0 + 0.1 * jax.random.normal(next(keys), (c,), jnp.float32)
        b = 0.1 * jax.random.normal(next(keys), (c,), jnp.float32)
        m = 0.1 * jax.random.normal(next(keys), (c,), jnp.float32)
        v = jax.random.uniform(next(keys), (c,), jnp.float32, minval=0.5, maxval=1.5)
        return g, b, m, v

    p = {}
    p["fc1_w"], p["fc1_b"] = lin(in_dim, hidden_dim)
    p["bn1_g"], p["bn1_b"], p["bn1_m"], p["bn1_v"] = bn(hidden_dim)
    p["fc2_w"], p["fc2_b"] = lin(hidden_dim, hidden_dim)
    p["bn2_g"], p["bn2_b"], p["bn2_m"], p["bn2_v"] = bn(hidden_dim)
    p["fc3_w"], p["fc3_b"] = lin(hidden_dim, out_dim)
    p["bn3_g"], p["bn3_b"], p["bn3_m"], p["bn3_v"] = bn(out_dim)
    p["fc4_w"], p["fc4_b"] = lin(out_dim, binary)
    return p


def ref_module(x, p):
    """Original PyTorch forward (eval-mode BN), full f32."""
    def bn(h, g, b, m, v):
        return g * (h - m) / jnp.sqrt(v + EPS) + b
    h = bn(jnp.maximum(x @ p["fc1_w"].T + p["fc1_b"], 0.0),
           p["bn1_g"], p["bn1_b"], p["bn1_m"], p["bn1_v"])
    h = bn(jnp.maximum(h @ p["fc2_w"].T + p["fc2_b"], 0.0),
           p["bn2_g"], p["bn2_b"], p["bn2_m"], p["bn2_v"])
    h = bn(jnp.maximum(h @ p["fc3_w"].T + p["fc3_b"], 0.0),
           p["bn3_g"], p["bn3_b"], p["bn3_m"], p["bn3_v"])
    return h @ p["fc4_w"].T + p["fc4_b"]


def ref_prepared(x, prep):
    """Reference mirroring the kernel's folded / int8-quantised / bf16 math in f32."""
    f32 = jnp.float32
    wd = prep["weight_dtype"]
    xq = x.astype(wd).astype(f32)
    pad = prep["w1"].shape[0] - prep["in_dim"]
    if pad:
        xq = jnp.pad(xq, ((0, 0), (0, pad)))
    w1f = prep["w1"].astype(wd).astype(f32)      # int8 -> bf16 is exact (|q| <= 127)
    h = jnp.maximum((xq @ w1f) * prep["s1"] + prep["b1"], 0.0)
    h = jnp.maximum(h.astype(wd).astype(f32) @ prep["w2"].astype(f32) + prep["b2"], 0.0)
    h = jnp.maximum(h.astype(wd).astype(f32) @ prep["w3"].astype(f32) + prep["b3"], 0.0)
    if prep["fc4_vpu"]:
        return jnp.sum(h * prep["w4"], axis=-1, keepdims=True) + prep["b4"]
    return h.astype(wd).astype(f32) @ prep["w4"].astype(f32) + prep["b4"]


# ----------------------------------------------------------------------------
if __name__ == "__main__":
    # Small shapes consistent with the module (real: in=129536, hid=512, out=128,
    # binary=1).  Per review, larger per-call batch amortises the w1 HBM stream.
    B, IN_DIM, HIDDEN, OUT_DIM, BINARY = 32, 2048, 512, 128, 1
    TK = 512  # real in_dim: ~8192 on v5e/v6e, ~12288-16384 on v7x (with raised vmem limit)

    key = jax.random.PRNGKey(0)
    kx, kp = jax.random.split(key)
    x = jax.random.normal(kx, (B, IN_DIM), jnp.float32)
    params = init_params(kp, IN_DIM, HIDDEN, OUT_DIM, BINARY)
    prep = prepare_params(params, tk=TK, weight_dtype=jnp.bfloat16, quantize_w1=True)

    out = mlp_decoder(x, prep)
    jax.block_until_ready(out)
    assert out.shape == (B, BINARY) and out.dtype == jnp.float32

    # Tight check against a reference mirroring the kernel's folded/quantised math.
    ref_q = ref_prepared(x, prep)
    assert jnp.allclose(out, ref_q, atol=5e-3, rtol=5e-3), \
        f"max diff vs prepared ref: {float(jnp.max(jnp.abs(out - ref_q)))}"

    # Loose check against the original (unfolded, full-f32) module semantics;
    # bounds the combined bf16 activation + int8-w1 quantisation error.
    ref_f = ref_module(x, params)
    assert jnp.allclose(out, ref_f, atol=5e-2, rtol=5e-2), \
        f"max diff vs module ref: {float(jnp.max(jnp.abs(out - ref_f)))}"

    print("KERNEL_OK")
</pallas_src>

<mosaic_0001>
module attributes {stable_mosaic.version = 11 : i64} {
  func.func @mlp_decoder_kernel(%arg0: i32, %arg1: memref<4x32x512xbf16, #tpu.memory_space<vmem>>, %arg2: memref<512x512xi8, #tpu.memory_space<vmem>>, %arg3: memref<1x512xf32, #tpu.memory_space<vmem>>, %arg4: memref<1x512xf32, #tpu.memory_space<vmem>>, %arg5: memref<512x512xbf16, #tpu.memory_space<vmem>>, %arg6: memref<1x512xf32, #tpu.memory_space<vmem>>, %arg7: memref<512x128xbf16, #tpu.memory_space<vmem>>, %arg8: memref<1x128xf32, #tpu.memory_space<vmem>>, %arg9: memref<1x128xf32, #tpu.memory_space<vmem>>, %arg10: memref<1x1xf32, #tpu.memory_space<vmem>>, %arg11: memref<32x1xf32, #tpu.memory_space<vmem>>, %arg12: memref<32x512xf32, #tpu.memory_space<vmem>>) attributes {dimension_semantics = [#tpu.dimension_semantics<arbitrary>], iteration_bounds = array<i64: 4>, scalar_prefetch = 0 : i64, scratch_operands = 1 : i64, tpu.core_type = #tpu.core_type<tc>, window_params = [{pipeline_mode = #tpu.pipeline_mode<synchronous>, transform_indices = @transform_0, window_bounds = array<i64: 4, 32, 512>}, {transform_indices = @transform_1, window_bounds = array<i64: 512, 512>}, {pipeline_mode = #tpu.pipeline_mode<synchronous>, transform_indices = @transform_2, window_bounds = array<i64: 1, 512>}, {pipeline_mode = #tpu.pipeline_mode<synchronous>, transform_indices = @transform_3, window_bounds = array<i64: 1, 512>}, {pipeline_mode = #tpu.pipeline_mode<synchronous>, transform_indices = @transform_4, window_bounds = array<i64: 512, 512>}, {pipeline_mode = #tpu.pipeline_mode<synchronous>, transform_indices = @transform_5, window_bounds = array<i64: 1, 512>}, {pipeline_mode = #tpu.pipeline_mode<synchronous>, transform_indices = @transform_6, window_bounds = array<i64: 512, 128>}, {pipeline_mode = #tpu.pipeline_mode<synchronous>, transform_indices = @transform_7, window_bounds = array<i64: 1, 128>}, {pipeline_mode = #tpu.pipeline_mode<synchronous>, transform_indices = @transform_8, window_bounds = array<i64: 1, 128>}, {pipeline_mode = #tpu.pipeline_mode<synchronous>, transform_indices = @transform_9, window_bounds = array<i64: 1, 1>}, {pipeline_mode = #tpu.pipeline_mode<synchronous>, transform_indices = @transform_10, window_bounds = array<i64: 32, 1>}]} {
    %c0_i32 = arith.constant 0 : i32
    %0 = arith.cmpi eq, %arg0, %c0_i32 : i32
    %1 = arith.extui %0 : i1 to i32
    %c0_i32_0 = arith.constant 0 : i32
    %2 = arith.cmpi ne, %1, %c0_i32_0 : i32
    scf.if %2 {
      %cst_9 = arith.constant 0.000000e+00 : f32
      %15 = vector.broadcast %cst_9 : f32 to vector<32x512xf32>
      %c0_10 = arith.constant 0 : index
      %c0_11 = arith.constant 0 : index
      %16 = vector.load %arg12[%c0_10, %c0_11] : memref<32x512xf32, #tpu.memory_space<vmem>>, vector<32x512xf32>
      tpu.vector_store %arg12[%c0_10, %c0_11], %15 {strides = array<i32>} : memref<32x512xf32, #tpu.memory_space<vmem>>, vector<32x512xf32>,
    } else {
    }
    %3 = arith.index_cast %arg0 : i32 to index
    %c0 = arith.constant 0 : index
    %c0_1 = arith.constant 0 : index
    %4 = vector.load %arg1[%3, %c0, %c0_1] : memref<4x32x512xbf16, #tpu.memory_space<vmem>>, vector<1x32x512xbf16>
    %5 = vector.shape_cast %4 : vector<1x32x512xbf16> to vector<32x512xbf16>
    %c0_2 = arith.constant 0 : index
    %c0_3 = arith.constant 0 : index
    %6 = vector.load %arg2[%c0_2, %c0_3] : memref<512x512xi8, #tpu.memory_space<vmem>>, vector<512x512xi8>
    %7 = arith.sitofp %6 : vector<512x512xi8> to vector<512x512xbf16>
    %c0_4 = arith.constant 0 : index
    %c0_5 = arith.constant 0 : index
    %8 = vector.load %arg12[%c0_4, %c0_5] : memref<32x512xf32, #tpu.memory_space<vmem>>, vector<32x512xf32>
    %cst = arith.constant dense<0.000000e+00> : vector<32x512xf32>
    %9 = tpu.matmul %5, %7, %cst {dimension_numbers = #tpu.dot_dimension_numbers<[1], [0], [0], [1], [0, 0, 1, 1], [], []>} : vector<32x512xbf16>, vector<512x512xbf16>, vector<32x512xf32> -> vector<32x512xf32>
    %10 = arith.addf %8, %9 : vector<32x512xf32>
    %c0_6 = arith.constant 0 : index
    %c0_7 = arith.constant 0 : index
    %11 = vector.load %arg12[%c0_6, %c0_7] : memref<32x512xf32, #tpu.memory_space<vmem>>, vector<32x512xf32>
    tpu.vector_store %arg12[%c0_6, %c0_7], %10 {strides = array<i32>} : memref<32x512xf32, #tpu.memory_space<vmem>>, vector<32x512xf32>,
    %c3_i32 = arith.constant 3 : i32
    %12 = arith.cmpi eq, %arg0, %c3_i32 : i32
    %13 = arith.extui %12 : i1 to i32
    %c0_i32_8 = arith.constant 0 : i32
    %14 = arith.cmpi ne, %13, %c0_i32_8 : i32
    scf.if %14 {
      %c0_9 = arith.constant 0 : index
      %c0_10 = arith.constant 0 : index
      %15 = vector.load %arg12[%c0_9, %c0_10] : memref<32x512xf32, #tpu.memory_space<vmem>>, vector<32x512xf32>
      %c0_11 = arith.constant 0 : index
      %c0_12 = arith.constant 0 : index
      %16 = vector.load %arg3[%c0_11, %c0_12] : memref<1x512xf32, #tpu.memory_space<vmem>>, vector<1x512xf32>
      %17 = vector.broadcast %16 : vector<1x512xf32> to vector<32x512xf32>
      %18 = arith.mulf %15, %17 : vector<32x512xf32>
      %c0_13 = arith.constant 0 : index
      %c0_14 = arith.constant 0 : index
      %19 = vector.load %arg4[%c0_13, %c0_14] : memref<1x512xf32, #tpu.memory_space<vmem>>, vector<1x512xf32>
      %20 = vector.broadcast %19 : vector<1x512xf32> to vector<32x512xf32>
      %21 = arith.addf %18, %20 : vector<32x512xf32>
      %cst_15 = arith.constant 0.000000e+00 : f32
      %22 = vector.broadcast %cst_15 : f32 to vector<32x512xf32>
      %23 = arith.maximumf %21, %22 : vector<32x512xf32>
      %24 = arith.truncf %23 : vector<32x512xf32> to vector<32x512xbf16>
      %c0_16 = arith.constant 0 : index
      %c0_17 = arith.constant 0 : index
      %25 = vector.load %arg5[%c0_16, %c0_17] : memref<512x512xbf16, #tpu.memory_space<vmem>>, vector<512x512xbf16>
      %cst_18 = arith.constant dense<0.000000e+00> : vector<32x512xf32>
      %26 = tpu.matmul %24, %25, %cst_18 {dimension_numbers = #tpu.dot_dimension_numbers<[1], [0], [0], [1], [0, 0, 1, 1], [], []>} : vector<32x512xbf16>, vector<512x512xbf16>, vector<32x512xf32> -> vector<32x512xf32>
      %c0_19 = arith.constant 0 : index
      %c0_20 = arith.constant 0 : index
      %27 = vector.load %arg6[%c0_19, %c0_20] : memref<1x512xf32, #tpu.memory_space<vmem>>, vector<1x512xf32>
      %28 = vector.broadcast %27 : vector<1x512xf32> to vector<32x512xf32>
      %29 = arith.addf %26, %28 : vector<32x512xf32>
      %cst_21 = arith.constant 0.000000e+00 : f32
      %30 = vector.broadcast %cst_21 : f32 to vector<32x512xf32>
      %31 = arith.maximumf %29, %30 : vector<32x512xf32>
      %32 = arith.truncf %31 : vector<32x512xf32> to vector<32x512xbf16>
      %c0_22 = arith.constant 0 : index
      %c0_23 = arith.constant 0 : index
      %33 = vector.load %arg7[%c0_22, %c0_23] : memref<512x128xbf16, #tpu.memory_space<vmem>>, vector<512x128xbf16>
      %cst_24 = arith.constant dense<0.000000e+00> : vector<32x128xf32>
      %34 = tpu.matmul %32, %33, %cst_24 {dimension_numbers = #tpu.dot_dimension_numbers<[1], [0], [0], [1], [0, 0, 1, 1], [], []>} : vector<32x512xbf16>, vector<512x128xbf16>, vector<32x128xf32> -> vector<32x128xf32>
      %c0_25 = arith.constant 0 : index
      %c0_26 = arith.constant 0 : index
      %35 = vector.load %arg8[%c0_25, %c0_26] : memref<1x128xf32, #tpu.memory_space<vmem>>, vector<1x128xf32>
      %36 = vector.broadcast %35 : vector<1x128xf32> to vector<32x128xf32>
      %37 = arith.addf %34, %36 : vector<32x128xf32>
      %cst_27 = arith.constant 0.000000e+00 : f32
      %38 = vector.broadcast %cst_27 : f32 to vector<32x128xf32>
      %39 = arith.maximumf %37, %38 : vector<32x128xf32>
      %c0_28 = arith.constant 0 : index
      %c0_29 = arith.constant 0 : index
      %40 = vector.load %arg9[%c0_28, %c0_29] : memref<1x128xf32, #tpu.memory_space<vmem>>, vector<1x128xf32>
      %41 = vector.broadcast %40 : vector<1x128xf32> to vector<32x128xf32>
      %42 = arith.mulf %39, %41 : vector<32x128xf32>
      %cst_30 = arith.constant dense<0.000000e+00> : vector<32xf32>
      %43 = vector.multi_reduction <add>, %42, %cst_30 [1] : vector<32x128xf32> to vector<32xf32>
      %44 = vector.shape_cast %43 : vector<32xf32> to vector<32x1xf32>
      %c0_31 = arith.constant 0 : index
      %c0_32 = arith.constant 0 : index
      %45 = vector.load %arg10[%c0_31, %c0_32] : memref<1x1xf32, #tpu.memory_space<vmem>>, vector<1x1xf32>
      %46 = vector.broadcast %45 : vector<1x1xf32> to vector<32x1xf32>
      %47 = arith.addf %44, %46 : vector<32x1xf32>
      %c0_33 = arith.constant 0 : index
      %c0_34 = arith.constant 0 : index
      %48 = vector.load %arg11[%c0_33, %c0_34] : memref<32x1xf32, #tpu.memory_space<vmem>>, vector<32x1xf32>
      tpu.vector_store %arg11[%c0_33, %c0_34], %47 {strides = array<i32>} : memref<32x1xf32, #tpu.memory_space<vmem>>, vector<32x1xf32>,
    } else {
    }
    return
  }
  func.func @transform_0(%arg0: i32) -> (i32, i32, i32) {
    %c0_i32 = arith.constant 0 : i32
    %c0_i32_0 = arith.constant 0 : i32
    %c0_i32_1 = arith.constant 0 : i32
    %c0_i32_2 = arith.constant 0 : i32
    return %c0_i32, %c0_i32_0, %c0_i32_1 : i32, i32, i32
  }
  func.func @transform_1(%arg0: i32) -> (i32, i32) {
    %c0_i32 = arith.constant 0 : i32
    %c0_i32_0 = arith.constant 0 : i32
    return %arg0, %c0_i32 : i32, i32
  }
  func.func @transform_2(%arg0: i32) -> (i32, i32) {
    %c0_i32 = arith.constant 0 : i32
    %c0_i32_0 = arith.constant 0 : i32
    %c0_i32_1 = arith.constant 0 : i32
    return %c0_i32, %c0_i32_0 : i32, i32
  }
  func.func @transform_3(%arg0: i32) -> (i32, i32) {
    %c0_i32 = arith.constant 0 : i32
    %c0_i32_0 = arith.constant 0 : i32
    %c0_i32_1 = arith.constant 0 : i32
    return %c0_i32, %c0_i32_0 : i32, i32
  }
  func.func @transform_4(%arg0: i32) -> (i32, i32) {
    %c0_i32 = arith.constant 0 : i32
    %c0_i32_0 = arith.constant 0 : i32
    %c0_i32_1 = arith.constant 0 : i32
    return %c0_i32, %c0_i32_0 : i32, i32
  }
  func.func @transform_5(%arg0: i32) -> (i32, i32) {
    %c0_i32 = arith.constant 0 : i32
    %c0_i32_0 = arith.constant 0 : i32
    %c0_i32_1 = arith.constant 0 : i32
    return %c0_i32, %c0_i32_0 : i32, i32
  }
  func.func @transform_6(%arg0: i32) -> (i32, i32) {
    %c0_i32 = arith.constant 0 : i32
    %c0_i32_0 = arith.constant 0 : i32
    %c0_i32_1 = arith.constant 0 : i32
    return %c0_i32, %c0_i32_0 : i32, i32
  }
  func.func @transform_7(%arg0: i32) -> (i32, i32) {
    %c0_i32 = arith.constant 0 : i32
    %c0_i32_0 = arith.constant 0 : i32
    %c0_i32_1 = arith.constant 0 : i32
    return %c0_i32, %c0_i32_0 : i32, i32
  }
  func.func @transform_8(%arg0: i32) -> (i32, i32) {
    %c0_i32 = arith.constant 0 : i32
    %c0_i32_0 = arith.constant 0 : i32
    %c0_i32_1 = arith.constant 0 : i32
    return %c0_i32, %c0_i32_0 : i32, i32
  }
  func.func @transform_9(%arg0: i32) -> (i32, i32) {
    %c0_i32 = arith.constant 0 : i32
    %c0_i32_0 = arith.constant 0 : i32
    %c0_i32_1 = arith.constant 0 : i32
    return %c0_i32, %c0_i32_0 : i32, i32
  }
  func.func @transform_10(%arg0: i32) -> (i32, i32) {
    %c0_i32 = arith.constant 0 : i32
    %c0_i32_0 = arith.constant 0 : i32
    %c0_i32_1 = arith.constant 0 : i32
    return %c0_i32, %c0_i32_0 : i32, i32
  }
}

</mosaic_0001>

<bundles_post_ra>
// kernel: tpu_custom_call.1
= control target key start
LH: loop header
LB: loop body
LE: loop exit
PB: predicated region body
PF: predicated region fallthrough
CT: control target
= control target key end

     0   :  { %s3797_s0 = inlined_call_operand.hbm [shape: bf16[4,32,512], index: 0, kind: input, shape index: {}]   ;;  %s3798_s1 = inlined_call_operand.hbm [shape: s8[2048,512], index: 1, kind: input, shape index: {}]   ;;  %s3799_s2 = inlined_call_operand.vmem [shape: f32[1,512], index: 2, kind: input, shape index: {}]   ;;  %s3800_s3 = inlined_call_operand.hbm [shape: f32[1,512], index: 3, kind: input, shape index: {}]   ;;  %s3801_s4 = inlined_call_operand.hbm [shape: bf16[512,512], index: 4, kind: input, shape index: {}]   ;;  %s3802_s5 = inlined_call_operand.vmem [shape: f32[1,512], index: 5, kind: input, shape index: {}]   ;;  %s3803_s6 = inlined_call_operand.hbm [shape: bf16[512,128], index: 6, kind: input, shape index: {}]   ;;  %s3804_s7 = inlined_call_operand.vmem [shape: f32[1,128], index: 7, kind: input, shape index: {}]   ;;  %s3805_s8 = inlined_call_operand.vmem [shape: f32[1,128], index: 8, kind: input, shape index: {}]   ;;  %s3806_s9 = inlined_call_operand.<no memory space> [shape: f32[1,1], index: 9, kind: input, shape index: {}]   ;;  %s3807_s10 = inlined_call_operand.vmem [shape: f32[32,1], index: 10, kind: output, shape index: {}]  }
   0x1   :  { %v15_v0 = vstv %s3806_s9 }
   0x2   :  { %16 = vst [vmem:[#allocation3] sm:$0x1] %v15_v0 }
   0x3   :  { %17 = vsyncpa [#allocation5], 0 }
   0x4   :  { %18 = vsyncpa [#allocation7], 0 }
   0x5   :  { %20 = vsyncpa [#allocation7 + $0x1], 0 }
   0x6   :  { %21 = vsyncpa [#allocation10], 0  ;;  %s3402_s15 = smov 0   ;;  %s3404_s16 = smov 0  }
   0x7   :  { %s3406_s17 = smov 0   ;;  %s3408_s18 = smov 0  }
   0x8 LB: > { %s3421_s9 = sadd.s32 4294967295, %s3330_s18   ;;  %p68_p0 = scmp.ne.s32.totalorder %s3322_s16, %s3318_s15  ;;  %s3330_s18 = sphi %s3408_s18, %s3828_s18   ;;  %s3326_s17 = sphi %s3406_s17, %s3827_s17   ;;  %s3322_s16 = sphi %s3404_s16, %s3826_s16   ;;  %s3318_s15 = sphi %s3402_s15, %s3825_s15  }
   0x9   : > { %p3808_p1 = scmp.eq.s32.totalorder %s3421_s9, 0  ;;  %p2577_p2 = scmp.ge.s32.totalorder %s3330_s18, 1 }
   0xa   : > { %p268_p3 = scmp.lt.s32.totalorder %s3330_s18, 5  ;;  %s3332_s21 = smov [#allocation8]  }
   0xb   : > { %p3430_p5 = por %p3808_p1, %p68_p0  ;;  %s297_s22 = sshll.u32 %s3332_s21, 4  ;;  %s298_s22 = int_to_ptr.vmem [resolvable:$true] %s297_s22 }
   0xc   : > { %p3434_p6 = pnand %p2577_p2, %p268_p3  ;;  %s3333_s24 = smov [#allocation9]  }
   0xd   : > { %s3811_s19 = scalar_select %p3430_p5, 1, 0 }
   0xe   : > { %s3812_s20 = scalar_select %p3434_p6, 1, 0 }
   0xf   : > { %p2847_p7 = pneg %p3434_p6  ;;  %s307_s25 = sshll.u32 %s3333_s24, 4  ;;  %s308_s25 = int_to_ptr.vmem [resolvable:$true] %s307_s25 }
  0x10   : > { %s3334_s26 = smov [#allocation4]   ;;  %s3163_s28 = scalar_lea.vmem %s298_s22, 64 }
  0x11   : > { %p3442_p8 = pnand %p2847_p7, %p3808_p1  ;;  %s280_s27 = sshll.u32 %s3334_s26, 4  ;;  %s281_s27 = int_to_ptr.vmem [resolvable:$true] %s280_s27 }
  0x12   : > { %p3164_p10 = scmp.ne.s32.totalorder %s298_s22, %s3163_s28  ;;  %p3171_p13 = scmp.lt.s32.totalorder %s298_s22, %s298_s22 }
  0x13   : > { %p3154_p9 = pneg %p3442_p8  ;;  %p3172_p0 = scmp.lt.s32.totalorder %s3163_s28, %s3163_s28 }
  0x15   : > { %p3166_p11 = pnand %p3164_p10, %p3154_p9  ;;  %p3173_p2 = por %p3172_p0, %p3171_p13 }
  0x17   : > { %p3167_p12 = pneg %p3166_p11 }
  0x19   : > { %p3174_p3 = pnand %p3173_p2, %p3167_p12 }
  0x1b   : > { %3177 = shalt.err (!%p3174_p3)
}
  0x1c   : > { %2853 = dma.hbm_to_vmem [thread:$0]  (!%p3442_p8), %s3800_s3, 64, %s298_s22, [#allocation7]  }
  0x1d   : > { %s3189_s11 = scalar_lea.vmem %s308_s25, 16384  ;;  %p3197_p10 = scmp.lt.s32.totalorder %s308_s25, %s308_s25 }
  0x1e   : > { %p3190_p7 = scmp.ne.s32.totalorder %s308_s25, %s3189_s11  ;;  %p3198_p11 = scmp.lt.s32.totalorder %s3189_s11, %s3189_s11 }
  0x20   : > { %p3192_p4 = pnand %p3190_p7, %p3154_p9  ;;  %p3199_p5 = por %p3198_p11, %p3197_p10 }
  0x22   : > { %p3193_p1 = pneg %p3192_p4 }
  0x24   : > { %p3200_p6 = pnand %p3199_p5, %p3193_p1 }
  0x26   : > { %3203 = shalt.err (!%p3200_p6)
}
  0x27   : > { %s3335_s12 = smov 256   ;;  %s3336_s13 = smov 16  }
  0x28   : > { %2856 = dma.hbm_to_vmem [thread:$0]  (!%p3442_p8), %s3801_s4, 16384, %s308_s25, [#allocation10], %s3335_s12, %s3335_s12, %s3336_s13  }
  0x29   : > { %s3215_s21 = scalar_lea.vmem %s281_s27, 4096  ;;  %p3223_p0 = scmp.lt.s32.totalorder %s281_s27, %s281_s27 }
  0x2a   : > { %p3216_p12 = scmp.ne.s32.totalorder %s281_s27, %s3215_s21  ;;  %p3224_p2 = scmp.lt.s32.totalorder %s3215_s21, %s3215_s21 }
  0x2c   : > { %p3218_p4 = pnand %p3216_p12, %p3154_p9  ;;  %p3225_p1 = por %p3224_p2, %p3223_p0 }
  0x2e   : > { %p3219_p13 = pneg %p3218_p4 }
  0x30   : > { %p3226_p5 = pnand %p3225_p1, %p3219_p13 }
  0x32   : > { %3229 = shalt.err (!%p3226_p5)
}
  0x33   : > { %2850 = dma.hbm_to_vmem [thread:$0]  (!%p3442_p8), %s3797_s0, 4096, %s281_s27, [#allocation5], %s3335_s12, %s3335_s12, %s3336_s13  }
  0x34   : > { %s3337_s25 = smov [#allocation11]  }
  0x35   : > { %s323_s26 = sshll.u32 %s3337_s25, 4  ;;  %s324_s26 = int_to_ptr.vmem [resolvable:$true] %s323_s26 }
  0x36   : > { %s3241_s28 = scalar_lea.vmem %s324_s26, 4096  ;;  %p3249_p10 = scmp.lt.s32.totalorder %s324_s26, %s324_s26 }
  0x37   : > { %p3242_p6 = scmp.ne.s32.totalorder %s324_s26, %s3241_s28  ;;  %p3250_p11 = scmp.lt.s32.totalorder %s3241_s28, %s3241_s28 }
  0x39   : > { %p3244_p3 = pnand %p3242_p6, %p3154_p9  ;;  %p3251_p12 = por %p3250_p11, %p3249_p10 }
  0x3b   : > { %p3245_p7 = pneg %p3244_p3 }
  0x3d   : > { %p3252_p4 = pnand %p3251_p12, %p3245_p7 }
  0x3f   : > { %3255 = shalt.err (!%p3252_p4)
}
  0x40   : > { %s3338_s29 = smov 64   ;;  %s3339_s27 = smov 4  }
  0x41   : > { %2859 = dma.hbm_to_vmem [thread:$0]  (!%p3442_p8), %s3803_s6, 4096, %s324_s26, [#allocation10], %s3338_s29, %s3338_s29, %s3339_s27  }
  0x42   : > { %s3481_s12 = sadd.s32 1, %s3330_s18   ;;  %s55_s14 = sadd.s32 1, %s3326_s17 }
  0x43   : > { %s52_s13 = ssub.s32 %s3330_s18, %s3481_s12  ;;  %p62_p13 = scmp.ne.s32.totalorder %s3326_s17, %s3322_s16 }
  0x44   : > { %p53_p9 = scmp.eq.s32.totalorder %s52_s13, 0  ;;  %p63_p0 = scmp.eq.s32.totalorder %s3330_s18, 0 }
  0x45   : > { %p2868_p1 = scmp.lt.s32.totalorder %s3330_s18, 4  ;;  %s346_s21 = sand.u32 1, %s3330_s18  }
  0x46   : > { %s3490_s15 = scalar_select %p53_p9, %s3326_s17, %s55_s14  }
  0x47   : > { %p64_p2 = por %p63_p0, %p62_p13  ;;  %s348_s22 = sand.u32 1, %s3326_s17  }
  0x48   : > { %s2583_s24 = sshll.u32 %s348_s22, 9  ;;  %s2771_s23 = sshll.u32 %s3330_s18, 13 }
  0x49   : > { %s3499_s26 = scalar_lea.hbm %s3798_s1, %s2771_s23  ;;  %s350_s29 = scalar_lea.vmem [#allocation6], %s2583_s24 }
  0x4a   : > { %s358_s27 = sshll.u32 %s350_s29, 4  ;;  %p3503_p8 = pnand %p2868_p1, %p64_p2  ;;  %s3501_s27 = int_to_ptr.vmem [resolvable:$true] %s358_s27 }
  0x4b   : > { %s3507_s11 = scalar_lea.sflag [#allocation7], %s346_s21  ;;  %s3256_s18 = scalar_lea.hbm %s3499_s26, 8192 }
  0x4c   : > { %p3257_p5 = scmp.ne.s32.totalorder %s3499_s26, %s3256_s18  ;;  %p3258_p6 = pneg %p3503_p8 }
  0x4d   : > { %s3261_s22 = scalar_lea.hbm %s3798_s1, 32768  ;;  %p3262_p10 = scmp.lt.s32.totalorder %s3499_s26, %s3798_s1 }
  0x4e   : > { %p3259_p3 = pnand %p3258_p6, %p3257_p5  ;;  %p3263_p11 = scmp.lt.s32.totalorder %s3261_s22, %s3256_s18 }
  0x50   : > { %p3260_p7 = pneg %p3259_p3  ;;  %p3264_p12 = por %p3263_p11, %p3262_p10 }
  0x52   : > { %p3265_p4 = pnand %p3264_p12, %p3260_p7 }
  0x54   : > { %3268 = shalt.err (!%p3265_p4)
}
  0x55   : > { %s3269_s21 = scalar_lea.vmem %s3501_s27, 8192  ;;  %s3340_s25 = smov [#allocation6]  }
  0x56   : > { %p3270_p9 = scmp.ne.s32.totalorder %s3501_s27, %s3269_s21  ;;  %s3274_s28 = sshll.u32 %s3340_s25, 4  ;;  %s3275_s28 = int_to_ptr.vmem [resolvable:$false] %s3274_s28 }
  0x57   : > { %s3276_s29 = scalar_lea.vmem %s3275_s28, 16384  ;;  %p3277_p2 = scmp.lt.s32.totalorder %s3501_s27, %s3275_s28 }
  0x58   : > { %p3272_p13 = pnand %p3270_p9, %p3258_p6  ;;  %p3278_p1 = scmp.lt.s32.totalorder %s3276_s29, %s3269_s21 }
  0x5a   : > { %p3273_p0 = pneg %p3272_p13  ;;  %p3279_p5 = por %p3278_p1, %p3277_p2 }
  0x5c   : > { %p3280_p3 = pnand %p3279_p5, %p3273_p0 }
  0x5e   : > { %3283 = shalt.err (!%p3280_p3)
}
  0x5f   : > { %s3341_s18 = smov 512   ;;  %s3342_s13 = smov 32  }
  0x60   : > { %2863 = dma.hbm_to_vmem [thread:$0]  (!%p3503_p8), %s3499_s26, 8192, %s3501_s27, %s3507_s11, %s3341_s18, %s3341_s18, %s3342_s13  }
  0x61   : > { %p3815_p6 = scmp.ne.s32.totalorder %s3812_s20, 0 }
  0x62   : > { %p3816_p7 = scmp.eq.s32.totalorder (!%p3815_p6), %s3421_s9, 0 }
  0x63   : > { %370 = sbr.rel (%p3815_p6) target bundleno = 1169 (0x491), region = 60 }
  0x68   : > { %3301 = dma.done.wait (%p3816_p7), [#allocation5], 4096   ;;  %p3817_p10 = pmov %p3816_p7 }
  0x69   : > { %s376_s14 = sand.u32 1, %s3421_s9   ;;  %s378_s22 = sand.u32 1, %s3322_s16  }
  0x6a   : > { %3303 = vsyncadd (%p3817_p10), [#allocation5], 4294963200  ;;  %s2589_s24 = sshll.u32 %s378_s22, 9  ;;  %s377_s23 = scalar_lea.sflag [#allocation7], %s376_s14 }
  0x6b   : > { %s3536_s21 = scalar_lea.vmem [#allocation6], %s2589_s24  ;;  %p3818_p11 = scmp.ne.s32.totalorder %s3811_s19, 0 }
  0x6d   : > { %3305 = dma.done.wait (%p3818_p11), %s377_s23, 8192  }
  0x6e   : > { %3307 = vsyncadd (%p3818_p11), %s377_s23, 4294959104  ;;  %p3819_p8 = pmov %p3816_p7 }
  0x6f   : > { %p3820_p12 = pmov %p3816_p7 }
  0x70   : > { %3309 = dma.done.wait (%p3819_p8), [#allocation7], 64  }
  0x71   : > { %3311 = vsyncadd (%p3820_p12), [#allocation7], 4294967232  ;;  %p3821_p4 = pmov %p3816_p7 }
  0x73   : > { %3313 = dma.done.wait (%p3821_p4), [#allocation10], 20480   ;;  %p3822_p9 = pmov %p3821_p4 }
  0x74   : > { %p3823_p13 = scmp.ne.s32.totalorder %s3421_s9, 0 }
  0x75   : > { %3315 = vsyncadd (%p3822_p9), [#allocation10], 4294946816 }
  0x76   : > { %429 = sbr.rel (%p3823_p13) target bundleno = 132 (0x84), region = 84 }
  0x7b   : > { %v3343_v1 = vmov 0.0  }
  0x7c   : > { %430 = vst [vmem:[#allocation2 + $0x30] sm:$0xff] %v3343_v1  ;;  %431 = vst [vmem:[#allocation2] sm:$0xff] %v3343_v1 }
  0x7d   : > { %432 = vst [vmem:[#allocation2 + $0x58] sm:$0xff] %v3343_v1  ;;  %433 = vst [vmem:[#allocation2 + $0x18] sm:$0xff] %v3343_v1 }
  0x7e   : > { %434 = vst [vmem:[#allocation2 + $0x50] sm:$0xff] %v3343_v1  ;;  %435 = vst [vmem:[#allocation2 + $0x68] sm:$0xff] %v3343_v1 }
  0x7f   : > { %436 = vst [vmem:[#allocation2 + $0x8] sm:$0xff] %v3343_v1  ;;  %437 = vst [vmem:[#allocation2 + $0x48] sm:$0xff] %v3343_v1 }
  0x80   : > { %438 = vst [vmem:[#allocation2 + $0x40] sm:$0xff] %v3343_v1  ;;  %439 = vst [vmem:[#allocation2 + $0x20] sm:$0xff] %v3343_v1 }
  0x81   : > { %440 = vst [vmem:[#allocation2 + $0x10] sm:$0xff] %v3343_v1  ;;  %441 = vst [vmem:[#allocation2 + $0x38] sm:$0xff] %v3343_v1 }
  0x82   : > { %442 = vst [vmem:[#allocation2 + $0x60] sm:$0xff] %v3343_v1  ;;  %443 = vst [vmem:[#allocation2 + $0x70] sm:$0xff] %v3343_v1 }
  0x83   : > { %444 = vst [vmem:[#allocation2 + $0x78] sm:$0xff] %v3343_v1  ;;  %445 = vst [vmem:[#allocation2 + $0x28] sm:$0xff] %v3343_v1 }
  0x84 PF: > { %v470_v2 = vld [vmem:[%s3536_s21 + $0x68] sm:$0xff]  ;;  %v469_v4 = vld [vmem:[%s3536_s21 + $0x60] sm:$0xff]  ;;  %s2772_s19 = sshll.u32 %s3421_s9, 6  ;;  %p2604_p0 = scmp.ne.s32.totalorder %s3421_s9, 3 }
  0x85   : > { %v502_v3 = vld [vmem:[%s3536_s21 + $0x168] sm:$0xff]  ;;  %v546_v5 = vunpack.c.l.s8.bf16 %v470_v2  ;;  %v550_v6 = vunpack.c.h.s8.bf16 %v470_v2  ;;  %v501_v9 = vld [vmem:[%s3536_s21 + $0x160] sm:$0xff]  ;;  %v549_v10 = vunpack.c.h.s8.bf16 %v469_v4  ;;  %v545_v14 = vunpack.c.l.s8.bf16 %v469_v4  ;;  %s3563_s20 = scalar_lea.vmem [#allocation4], %s2772_s19 }
  0x86   : > { %v610_v7 = vunpack.c.l.s8.bf16 %v502_v3  ;;  %v614_v8 = vunpack.c.h.s8.bf16 %v502_v3  ;;  %v613_v11 = vunpack.c.h.s8.bf16 %v501_v9  ;;  %v466_v12 = vld [vmem:[%s3536_s21 + $0x48] sm:$0xff]  ;;  %v609_v15 = vunpack.c.l.s8.bf16 %v501_v9  ;;  %v465_v18 = vld [vmem:[%s3536_s21 + $0x40] sm:$0xff] }
  0x87   : > { %v498_v13 = vld [vmem:[%s3536_s21 + $0x148] sm:$0xff]  ;;  %705 = vmatprep.subr.bf16.mxu0 %v550_v6  ;;  %v542_v16 = vunpack.c.h.s8.bf16 %v466_v12  ;;  %v497_v19 = vld [vmem:[%s3536_s21 + $0x140] sm:$0xff]  ;;  %v541_v20 = vunpack.c.h.s8.bf16 %v465_v18  ;;  %v538_v22 = vunpack.c.l.s8.bf16 %v466_v12  ;;  %v537_v27 = vunpack.c.l.s8.bf16 %v465_v18 }
  0x88   : > { %758 = vmatprep.subr.bf16.mxu1 %v614_v8  ;;  %706 = vmatpush1.bf16.msra.mxu0 %v549_v10  ;;  %v606_v17 = vunpack.c.h.s8.bf16 %v498_v13  ;;  %v605_v21 = vunpack.c.h.s8.bf16 %v497_v19  ;;  %v602_v23 = vunpack.c.l.s8.bf16 %v498_v13  ;;  %v462_v24 = vld [vmem:[%s3536_s21 + $0x28] sm:$0xff]  ;;  %v3566_v26 = vld [vmem:[%s3563_s20 + $0x4] ss:$16 sps:$4 sm:$0xff]   ;;  %v601_v28 = vunpack.c.l.s8.bf16 %v497_v19 }
  0x89   : > { %759 = vmatpush1.bf16.msra.mxu1 %v613_v11  ;;  %707 = vmatprep.subr.bf16.mxu0 %v546_v5  ;;  %v494_v25 = vld [vmem:[%s3536_s21 + $0x128] sm:$0xff]  ;;  %v534_v29 = vunpack.c.h.s8.bf16 %v462_v24  ;;  %v461_v31 = vld [vmem:[%s3536_s21 + $0x20] sm:$0xff]  ;;  %v530_v36 = vunpack.c.l.s8.bf16 %v462_v24 }
  0x8a   : > { %760 = vmatprep.subr.bf16.mxu1 %v610_v7  ;;  %v598_v30 = vunpack.c.h.s8.bf16 %v494_v25  ;;  %v493_v32 = vld [vmem:[%s3536_s21 + $0x120] sm:$0xff]  ;;  %v3571_v33 = vld [vmem:[%s3563_s20 + $0xc] ss:$16 sps:$4 sm:$0xff]   ;;  %737 = vmatprep.mubr.bf16.mxu0 %v3566_v26  ;;  %v533_v34 = vunpack.c.h.s8.bf16 %v461_v31  ;;  %v594_v37 = vunpack.c.l.s8.bf16 %v494_v25  ;;  %v529_v40 = vunpack.c.l.s8.bf16 %v461_v31 }
  0x8b   : > { %790 = vmatprep.mubr.bf16.mxu1 %v3571_v33  ;;  %v597_v35 = vunpack.c.h.s8.bf16 %v493_v32  ;;  %v458_v38 = vld [vmem:[%s3536_s21 + $0x8] sm:$0xff]  ;;  %v593_v41 = vunpack.c.l.s8.bf16 %v493_v32  ;;  %v457_v44 = vld [vmem:[%s3536_s21] sm:$0xff] }
  0x8c   : > { %708 = vmatpush1.bf16.msra.mxu0 %v545_v14  ;;  %v490_v39 = vld [vmem:[%s3536_s21 + $0x108] sm:$0xff]  ;;  %v526_v42 = vunpack.c.h.s8.bf16 %v458_v38  ;;  %v489_v45 = vld [vmem:[%s3536_s21 + $0x100] sm:$0xff]  ;;  %v525_v46 = vunpack.c.h.s8.bf16 %v457_v44  ;;  %v522_v48 = vunpack.c.l.s8.bf16 %v458_v38  ;;  %v521_v52 = vunpack.c.l.s8.bf16 %v457_v44 }
  0x8d   : > { %761 = vmatpush1.bf16.msra.mxu1 %v609_v15  ;;  %709 = vmatprep.subr.bf16.mxu0 %v542_v16  ;;  %v590_v43 = vunpack.c.h.s8.bf16 %v490_v39  ;;  %v589_v47 = vunpack.c.h.s8.bf16 %v489_v45  ;;  %v586_v49 = vunpack.c.l.s8.bf16 %v490_v39  ;;  %v486_v50 = vld [vmem:[%s3536_s21 + $0xe8] sm:$0xff]  ;;  %v585_v53 = vunpack.c.l.s8.bf16 %v489_v45  ;;  %v485_v56 = vld [vmem:[%s3536_s21 + $0xe0] sm:$0xff] }
  0x8e   : > { %762 = vmatprep.subr.bf16.mxu1 %v606_v17  ;;  %v518_v51 = vld [vmem:[%s3536_s21 + $0x1e8] sm:$0xff]  ;;  %v582_v54 = vunpack.c.h.s8.bf16 %v486_v50  ;;  %v517_v57 = vld [vmem:[%s3536_s21 + $0x1e0] sm:$0xff]  ;;  %v581_v58 = vunpack.c.h.s8.bf16 %v485_v56  ;;  %v578_v60 = vunpack.c.l.s8.bf16 %v486_v50  ;;  %v577_v0 = vunpack.c.l.s8.bf16 %v485_v56  ;;  %v468_v50 = vld [vmem:[%s3536_s21 + $0x58] sm:$0xff] }
  0x8f   : > { %v646_v55 = vunpack.c.h.s8.bf16 %v518_v51  ;;  %v645_v59 = vunpack.c.h.s8.bf16 %v517_v57  ;;  %v642_v61 = vunpack.c.l.s8.bf16 %v518_v51  ;;  %v482_v62 = vld [vmem:[%s3536_s21 + $0xc8] sm:$0xff]  ;;  %v641_v1 = vunpack.c.l.s8.bf16 %v517_v57  ;;  %v481_v4 = vld [vmem:[%s3536_s21 + $0xc0] sm:$0xff]  ;;  %v500_v51 = vld [vmem:[%s3536_s21 + $0x158] sm:$0xff] }
  0x90   : > { %710 = vmatpush1.bf16.msra.mxu0 %v541_v20  ;;  %v514_v63 = vld [vmem:[%s3536_s21 + $0x1c8] sm:$0xff]  ;;  %v574_v2 = vunpack.c.h.s8.bf16 %v482_v62  ;;  %v513_v5 = vld [vmem:[%s3536_s21 + $0x1c0] sm:$0xff]  ;;  %v573_v6 = vunpack.c.h.s8.bf16 %v481_v4  ;;  %v570_v8 = vunpack.c.l.s8.bf16 %v482_v62  ;;  %v569_v12 = vunpack.c.l.s8.bf16 %v481_v4 }
  0x91   : > { %763 = vmatpush1.bf16.msra.mxu1 %v605_v21  ;;  %711 = vmatprep.subr.bf16.mxu0 %v538_v22  ;;  %v638_v3 = vunpack.c.h.s8.bf16 %v514_v63  ;;  %v637_v7 = vunpack.c.h.s8.bf16 %v513_v5  ;;  %v634_v9 = vunpack.c.l.s8.bf16 %v514_v63  ;;  %v478_v10 = vld [vmem:[%s3536_s21 + $0xa8] sm:$0xff]  ;;  %v633_v13 = vunpack.c.l.s8.bf16 %v513_v5  ;;  %v477_v16 = vld [vmem:[%s3536_s21 + $0xa0] sm:$0xff] }
  0x92   : > { %764 = vmatprep.subr.bf16.mxu1 %v602_v23  ;;  %v510_v11 = vld [vmem:[%s3536_s21 + $0x1a8] sm:$0xff]  ;;  %v566_v14 = vunpack.c.h.s8.bf16 %v478_v10  ;;  %v509_v17 = vld [vmem:[%s3536_s21 + $0x1a0] sm:$0xff]  ;;  %v565_v18 = vunpack.c.h.s8.bf16 %v477_v16  ;;  %v562_v20 = vunpack.c.l.s8.bf16 %v478_v10  ;;  %v561_v24 = vunpack.c.l.s8.bf16 %v477_v16 }
  0x93   : > { %v630_v15 = vunpack.c.h.s8.bf16 %v510_v11  ;;  %v629_v19 = vunpack.c.h.s8.bf16 %v509_v17  ;;  %v626_v21 = vunpack.c.l.s8.bf16 %v510_v11  ;;  %v474_v22 = vld [vmem:[%s3536_s21 + $0x88] sm:$0xff]  ;;  %v625_v25 = vunpack.c.l.s8.bf16 %v509_v17 }
  0x94   : > { %712 = vmatpush1.bf16.msra.mxu0 %v537_v27  ;;  %v506_v23 = vld [vmem:[%s3536_s21 + $0x188] sm:$0xff]  ;;  %v558_v27 = vunpack.c.h.s8.bf16 %v474_v22  ;;  %v544_v56 = vunpack.c.h.s8.bf16 %v468_v50  ;;  %v608_v57 = vunpack.c.h.s8.bf16 %v500_v51 }
  0x95   : > { %765 = vmatpush1.bf16.msra.mxu1 %v601_v28  ;;  %713 = vmatprep.subr.bf16.mxu0 %v534_v29  ;;  %v622_v28 = vunpack.c.h.s8.bf16 %v506_v23  ;;  %v473_v29 = vld [vmem:[%s3536_s21 + $0x80] sm:$0xff] }
  0x96   : > { %766 = vmatprep.subr.bf16.mxu1 %v598_v30  ;;  %v505_v30 = vld [vmem:[%s3536_s21 + $0x180] sm:$0xff]  ;;  %v557_v31 = vunpack.c.h.s8.bf16 %v473_v29  ;;  %v553_v38 = vunpack.c.l.s8.bf16 %v473_v29 }
  0x97   : > { %v621_v32 = vunpack.c.h.s8.bf16 %v505_v30  ;;  %v617_v39 = vunpack.c.l.s8.bf16 %v505_v30  ;;  %v3600_v44 = vld [vmem:[%s3563_s20] ss:$16 sps:$4 sm:$0xff]   ;;  %v3603_v45 = vld [vmem:[%s3563_s20 + $0x8] ss:$16 sps:$4 sm:$0xff]  }
  0x98   : > { %714 = vmatpush1.bf16.msra.mxu0 %v533_v34  ;;  %v554_v34 = vunpack.c.l.s8.bf16 %v474_v22 }
  0x99   : > { %767 = vmatpush1.bf16.msra.mxu1 %v597_v35  ;;  %715 = vmatprep.subr.bf16.mxu0 %v530_v36  ;;  %v618_v35 = vunpack.c.l.s8.bf16 %v506_v23  ;;  %v472_v36 = vld [vmem:[%s3536_s21 + $0x78] sm:$0xff] }
  0x9a   : > { %768 = vmatprep.subr.bf16.mxu1 %v594_v37  ;;  %v504_v37 = vld [vmem:[%s3536_s21 + $0x178] sm:$0xff] }
  0x9c   : > { %716 = vmatpush1.bf16.msra.mxu0 %v529_v40  ;;  %v552_v40 = vunpack.c.h.s8.bf16 %v472_v36 }
  0x9d   : > { %769 = vmatpush1.bf16.msra.mxu1 %v593_v41  ;;  %717 = vmatprep.subr.bf16.mxu0 %v526_v42  ;;  %v616_v41 = vunpack.c.h.s8.bf16 %v504_v37  ;;  %v471_v42 = vld [vmem:[%s3536_s21 + $0x70] sm:$0xff] }
  0x9e   : > { %770 = vmatprep.subr.bf16.mxu1 %v590_v43  ;;  %v503_v43 = vld [vmem:[%s3536_s21 + $0x170] sm:$0xff] }
  0xa0   : > { %718 = vmatpush1.bf16.msra.mxu0 %v525_v46  ;;  %v551_v46 = vunpack.c.h.s8.bf16 %v471_v42 }
  0xa1   : > { %771 = vmatpush1.bf16.msra.mxu1 %v589_v47  ;;  %719 = vmatprep.subr.bf16.mxu0 %v522_v48  ;;  %v615_v47 = vunpack.c.h.s8.bf16 %v503_v43  ;;  %v548_v48 = vunpack.c.l.s8.bf16 %v472_v36 }
  0xa2   : > { %772 = vmatprep.subr.bf16.mxu1 %v586_v49  ;;  %v612_v49 = vunpack.c.l.s8.bf16 %v504_v37 }
  0xa4   : > { %720 = vmatpush1.bf16.msra.mxu0 %v521_v52  ;;  %v3608_v52 = vld [vmem:[%s3563_s20 + $0x24] ss:$16 sps:$4 sm:$0xff]  }
  0xa5   : > { %773 = vmatpush1.bf16.msra.mxu1 %v585_v53  ;;  %721 = vmatprep.subr.bf16.mxu0 %v582_v54  ;;  %v3611_v53 = vld [vmem:[%s3563_s20 + $0x2c] ss:$16 sps:$4 sm:$0xff]   ;;  %v547_v54 = vunpack.c.l.s8.bf16 %v471_v42 }
  0xa6   : > { %774 = vmatprep.subr.bf16.mxu1 %v646_v55  ;;  %v611_v55 = vunpack.c.l.s8.bf16 %v503_v43 }
  0xa8   : > { %722 = vmatpush2.bf16.msra.mxu0 %v581_v58  ;;  %v467_v58 = vld [vmem:[%s3536_s21 + $0x50] sm:$0xff] }
  0xa9   : > { %775 = vmatpush2.bf16.msra.mxu1 %v645_v59  ;;  %723 = vmatprep.subr.bf16.mxu0 %v578_v60  ;;  %v499_v59 = vld [vmem:[%s3536_s21 + $0x150] sm:$0xff]  ;;  %v543_v62 = vunpack.c.h.s8.bf16 %v467_v58  ;;  %v539_v4 = vunpack.c.l.s8.bf16 %v467_v58 }
  0xaa   : > { %776 = vmatprep.subr.bf16.mxu1 %v642_v61  ;;  %v3620_v60 = vld [vmem:[%s3563_s20 + $0x20] ss:$16 sps:$4 sm:$0xff]   ;;  %v3623_v61 = vld [vmem:[%s3563_s20 + $0x28] ss:$16 sps:$4 sm:$0xff]   ;;  %v607_v63 = vunpack.c.h.s8.bf16 %v499_v59  ;;  %v603_v5 = vunpack.c.l.s8.bf16 %v499_v59 }
  0xac   : > { %724 = vmatpush2.bf16.msra.mxu0 %v577_v0  ;;  %v540_v0 = vunpack.c.l.s8.bf16 %v468_v50 }
  0xad   : > { %777 = vmatpush2.bf16.msra.mxu1 %v641_v1  ;;  %725 = vmatprep.subr.bf16.mxu0 %v574_v2  ;;  %v604_v1 = vunpack.c.l.s8.bf16 %v500_v51  ;;  %v464_v2 = vld [vmem:[%s3536_s21 + $0x38] sm:$0xff] }
  0xae   : > { %778 = vmatprep.subr.bf16.mxu1 %v638_v3  ;;  %v496_v3 = vld [vmem:[%s3536_s21 + $0x138] sm:$0xff] }
  0xb0   : > { %726 = vmatpush2.bf16.msra.mxu0 %v573_v6  ;;  %v536_v6 = vunpack.c.h.s8.bf16 %v464_v2 }
  0xb1   : > { %779 = vmatpush2.bf16.msra.mxu1 %v637_v7  ;;  %727 = vmatprep.subr.bf16.mxu0 %v570_v8  ;;  %v600_v7 = vunpack.c.h.s8.bf16 %v496_v3  ;;  %v463_v8 = vld [vmem:[%s3536_s21 + $0x30] sm:$0xff] }
  0xb2   : > { %780 = vmatprep.subr.bf16.mxu1 %v634_v9  ;;  %v495_v9 = vld [vmem:[%s3536_s21 + $0x130] sm:$0xff]  ;;  %v535_v10 = vunpack.c.h.s8.bf16 %v463_v8  ;;  %v531_v16 = vunpack.c.l.s8.bf16 %v463_v8 }
  0xb3   : > { %v599_v11 = vunpack.c.h.s8.bf16 %v495_v9  ;;  %v595_v17 = vunpack.c.l.s8.bf16 %v495_v9 }
  0xb4   : > { %728 = vmatpush2.bf16.msra.mxu0 %v569_v12  ;;  %v532_v12 = vunpack.c.l.s8.bf16 %v464_v2 }
  0xb5   : > { %781 = vmatpush2.bf16.msra.mxu1 %v633_v13  ;;  %729 = vmatprep.subr.bf16.mxu0 %v566_v14  ;;  %v596_v13 = vunpack.c.l.s8.bf16 %v496_v3  ;;  %v460_v14 = vld [vmem:[%s3536_s21 + $0x18] sm:$0xff] }
  0xb6   : > { %782 = vmatprep.subr.bf16.mxu1 %v630_v15  ;;  %v492_v15 = vld [vmem:[%s3536_s21 + $0x118] sm:$0xff]  ;;  %v524_v22 = vunpack.c.l.s8.bf16 %v460_v14 }
  0xb7   : > { %v588_v23 = vunpack.c.l.s8.bf16 %v492_v15 }
  0xb8   : > { %730 = vmatpush2.bf16.msra.mxu0 %v565_v18  ;;  %v459_v18 = vld [vmem:[%s3536_s21 + $0x10] sm:$0xff] }
  0xb9   : > { %783 = vmatpush2.bf16.msra.mxu1 %v629_v19  ;;  %731 = vmatprep.subr.bf16.mxu0 %v562_v20  ;;  %v491_v19 = vld [vmem:[%s3536_s21 + $0x110] sm:$0xff]  ;;  %v527_v20 = vunpack.c.h.s8.bf16 %v459_v18 }
  0xba   : > { %784 = vmatprep.subr.bf16.mxu1 %v626_v21  ;;  %v591_v21 = vunpack.c.h.s8.bf16 %v491_v19 }
  0xbc   : > { %732 = vmatpush2.bf16.msra.mxu0 %v561_v24  ;;  %v488_v24 = vld [vmem:[%s3536_s21 + $0xf8] sm:$0xff] }
  0xbd   : > { %785 = vmatpush2.bf16.msra.mxu1 %v625_v25  ;;  %733 = vmatprep.subr.bf16.mxu0 %v558_v27  ;;  %v520_v25 = vld [vmem:[%s3536_s21 + $0x1f8] sm:$0xff]  ;;  %v523_v27 = vunpack.c.l.s8.bf16 %v459_v18  ;;  %v584_v29 = vunpack.c.h.s8.bf16 %v488_v24  ;;  %v580_v36 = vunpack.c.l.s8.bf16 %v488_v24 }
  0xbe   : > { %786 = vmatprep.subr.bf16.mxu1 %v622_v28  ;;  %v587_v28 = vunpack.c.l.s8.bf16 %v491_v19  ;;  %v648_v30 = vunpack.c.h.s8.bf16 %v520_v25  ;;  %v644_v37 = vunpack.c.l.s8.bf16 %v520_v25  ;;  %v653_v25 = vld [vmem:[#allocation2 + $0x50] sm:$0xff] }
  0xc0   : > { %734 = vmatpush2.bf16.msra.mxu0 %v557_v31  ;;  %v487_v31 = vld [vmem:[%s3536_s21 + $0xf0] sm:$0xff] }
  0xc1   : > { %787 = vmatpush2.bf16.msra.mxu1 %v621_v32  ;;  %735 = vmatprep.subr.bf16.mxu0 %v554_v34  ;;  %v519_v32 = vld [vmem:[%s3536_s21 + $0x1f0] sm:$0xff]  ;;  %v583_v34 = vunpack.c.h.s8.bf16 %v487_v31 }
  0xc2   : > { %788 = vmatprep.subr.bf16.mxu1 %v618_v35  ;;  %v647_v35 = vunpack.c.h.s8.bf16 %v519_v32 }
  0xc4   : > { %736 = vmatpush2.bf16.msra.mxu0 %v553_v38  ;;  %v484_v38 = vld [vmem:[%s3536_s21 + $0xd8] sm:$0xff] }
  0xc5   : > { %789 = vmatpush2.bf16.msra.mxu1 %v617_v39  ;;  %811 = vmatprep.subr.bf16.mxu0 %v552_v40  ;;  %v516_v39 = vld [vmem:[%s3536_s21 + $0x1d8] sm:$0xff]  ;;  %v579_v40 = vunpack.c.l.s8.bf16 %v487_v31  ;;  %v576_v42 = vunpack.c.h.s8.bf16 %v484_v38  ;;  %v572_v50 = vunpack.c.l.s8.bf16 %v484_v38 }
  0xc6   : > { %864 = vmatprep.subr.bf16.mxu1 %v616_v41  ;;  %v643_v41 = vunpack.c.l.s8.bf16 %v519_v32  ;;  %v640_v43 = vunpack.c.h.s8.bf16 %v516_v39  ;;  %v636_v51 = vunpack.c.l.s8.bf16 %v516_v39  ;;  %v657_v31 = vld [vmem:[#allocation2 + $0x40] sm:$0xff] }
  0xc7   : > { %738 = vmatmul.mubr.bf16.vlgmr.msra.gmra.mxu0 %v3600_v44 }
  0xc8   : > { %791 = vmatmul.mubr.bf16.vlgmr.msra.gmra.mxu1 %v3603_v45  ;;  %812 = vmatpush1.bf16.msra.mxu0 %v551_v46  ;;  %v483_v46 = vld [vmem:[%s3536_s21 + $0xd0] sm:$0xff] }
  0xc9   : > { %865 = vmatpush1.bf16.msra.mxu1 %v615_v47  ;;  %813 = vmatprep.subr.bf16.mxu0 %v548_v48  ;;  %v515_v47 = vld [vmem:[%s3536_s21 + $0x1d0] sm:$0xff]  ;;  %v575_v48 = vunpack.c.h.s8.bf16 %v483_v46 }
  0xca   : > { %866 = vmatprep.subr.bf16.mxu1 %v612_v49  ;;  %747 = vmatprep.mubr.bf16.mxu0 %v3608_v52  ;;  %v639_v49 = vunpack.c.h.s8.bf16 %v515_v47 }
  0xcb   : > { %800 = vmatprep.mubr.bf16.mxu1 %v3611_v53 }
  0xcc   : > { %814 = vmatpush1.bf16.msra.mxu0 %v547_v54  ;;  %v480_v54 = vld [vmem:[%s3536_s21 + $0xb8] sm:$0xff] }
  0xcd   : > { %867 = vmatpush1.bf16.msra.mxu1 %v611_v55  ;;  %815 = vmatprep.subr.bf16.mxu0 %v544_v56  ;;  %v512_v55 = vld [vmem:[%s3536_s21 + $0x1b8] sm:$0xff]  ;;  %v571_v56 = vunpack.c.l.s8.bf16 %v483_v46  ;;  %v568_v58 = vunpack.c.h.s8.bf16 %v480_v54  ;;  %v564_v2 = vunpack.c.l.s8.bf16 %v480_v54 }
  0xce   : > { %868 = vmatprep.subr.bf16.mxu1 %v608_v57  ;;  %v635_v57 = vunpack.c.l.s8.bf16 %v515_v47  ;;  %v632_v59 = vunpack.c.h.s8.bf16 %v512_v55  ;;  %v628_v3 = vunpack.c.l.s8.bf16 %v512_v55 }
  0xcf   : > { %748 = vmatmul.mubr.bf16.gmra.mxu0 %v3620_v60 }
  0xd0   : > { %801 = vmatmul.mubr.bf16.gmra.mxu1 %v3623_v61  ;;  %816 = vmatpush1.bf16.msra.mxu0 %v543_v62  ;;  %v479_v62 = vld [vmem:[%s3536_s21 + $0xb0] sm:$0xff] }
  0xd1   : > { %869 = vmatpush1.bf16.msra.mxu1 %v607_v63  ;;  %817 = vmatprep.subr.bf16.mxu0 %v540_v0  ;;  %v511_v63 = vld [vmem:[%s3536_s21 + $0x1b0] sm:$0xff]  ;;  %v567_v0 = vunpack.c.h.s8.bf16 %v479_v62 }
  0xd2   : > { %870 = vmatprep.subr.bf16.mxu1 %v604_v1  ;;  %843 = vmatprep.mubr.bf16.mxu0 %v3566_v26  ;;  %v528_v26 = vunpack.c.h.s8.bf16 %v460_v14  ;;  %v631_v1 = vunpack.c.h.s8.bf16 %v511_v63 }
  0xd3   : > { %896 = vmatprep.mubr.bf16.mxu1 %v3571_v33  ;;  %v592_v33 = vunpack.c.h.s8.bf16 %v492_v15 }
  0xd4   : > { %818 = vmatpush1.bf16.msra.mxu0 %v539_v4  ;;  %v476_v4 = vld [vmem:[%s3536_s21 + $0x98] sm:$0xff] }
  0xd5   : > { %871 = vmatpush1.bf16.msra.mxu1 %v603_v5  ;;  %819 = vmatprep.subr.bf16.mxu0 %v536_v6  ;;  %v508_v5 = vld [vmem:[%s3536_s21 + $0x198] sm:$0xff]  ;;  %v563_v6 = vunpack.c.l.s8.bf16 %v479_v62  ;;  %v560_v8 = vunpack.c.h.s8.bf16 %v476_v4  ;;  %v556_v14 = vunpack.c.l.s8.bf16 %v476_v4  ;;  %v655_v4 = vld [vmem:[#allocation2 + $0x8] sm:$0xff] }
  0xd6   : > { %872 = vmatprep.subr.bf16.mxu1 %v600_v7  ;;  %v627_v7 = vunpack.c.l.s8.bf16 %v511_v63  ;;  %v624_v9 = vunpack.c.h.s8.bf16 %v508_v5  ;;  %v620_v15 = vunpack.c.l.s8.bf16 %v508_v5  ;;  %v652_v63 = vld [vmem:[#allocation2 + $0x18] sm:$0xff] }
  0xd8   : > { %820 = vmatpush1.bf16.msra.mxu0 %v535_v10  ;;  %v475_v10 = vld [vmem:[%s3536_s21 + $0x90] sm:$0xff] }
  0xd9   : > { %873 = vmatpush1.bf16.msra.mxu1 %v599_v11  ;;  %821 = vmatprep.subr.bf16.mxu0 %v532_v12  ;;  %v507_v11 = vld [vmem:[%s3536_s21 + $0x190] sm:$0xff]  ;;  %v559_v12 = vunpack.c.h.s8.bf16 %v475_v10 }
  0xda   : > { %874 = vmatprep.subr.bf16.mxu1 %v596_v13  ;;  %v623_v13 = vunpack.c.h.s8.bf16 %v507_v11 }
  0xdc   : > { %822 = vmatpush1.bf16.msra.mxu0 %v531_v16  ;;  %v555_v16 = vunpack.c.l.s8.bf16 %v475_v10 }
  0xdd   : > { %875 = vmatpush1.bf16.msra.mxu1 %v595_v17  ;;  %823 = vmatprep.subr.bf16.mxu0 %v528_v26  ;;  %v619_v17 = vunpack.c.l.s8.bf16 %v507_v11 }
  0xde   : > { %876 = vmatprep.subr.bf16.mxu1 %v592_v33  ;;  %v649_v33 = vld [vmem:[#allocation2 + $0x30] sm:$0xff] }
  0xe0   : > { %824 = vmatpush1.bf16.msra.mxu0 %v527_v20 }
  0xe1   : > { %877 = vmatpush1.bf16.msra.mxu1 %v591_v21  ;;  %825 = vmatprep.subr.bf16.mxu0 %v524_v22  ;;  %v650_v21 = vld [vmem:[#allocation2] sm:$0xff] }
  0xe2   : > { %878 = vmatprep.subr.bf16.mxu1 %v588_v23 }
  0xe4   : > { %826 = vmatpush1.bf16.msra.mxu0 %v523_v27 }
  0xe5   : > { %879 = vmatpush1.bf16.msra.mxu1 %v587_v28  ;;  %827 = vmatprep.subr.bf16.mxu0 %v584_v29  ;;  %v654_v28 = vld [vmem:[#allocation2 + $0x68] sm:$0xff] }
  0xe6   : > { %880 = vmatprep.subr.bf16.mxu1 %v648_v30 }
  0xe8   : > { %828 = vmatpush2.bf16.msra.mxu0 %v583_v34 }
  0xe9   : > { %881 = vmatpush2.bf16.msra.mxu1 %v647_v35  ;;  %829 = vmatprep.subr.bf16.mxu0 %v580_v36 }
  0xea   : > { %882 = vmatprep.subr.bf16.mxu1 %v644_v37  ;;  %v658_v37 = vld [vmem:[#allocation2 + $0x20] sm:$0xff] }
  0xec   : > { %830 = vmatpush2.bf16.msra.mxu0 %v579_v40 }
  0xed   : > { %883 = vmatpush2.bf16.msra.mxu1 %v643_v41  ;;  %831 = vmatprep.subr.bf16.mxu0 %v576_v42  ;;  %v661_v42 = vld [vmem:[#allocation2 + $0x60] sm:$0xff] }
  0xee   : > { %884 = vmatprep.subr.bf16.mxu1 %v640_v43 }
  0xf0   : > { %832 = vmatpush2.bf16.msra.mxu0 %v575_v48 }
  0xf1   : > { %885 = vmatpush2.bf16.msra.mxu1 %v639_v49  ;;  %833 = vmatprep.subr.bf16.mxu0 %v572_v50  ;;  %v662_v49 = vld [vmem:[#allocation2 + $0x70] sm:$0xff] }
  0xf2   : > { %886 = vmatprep.subr.bf16.mxu1 %v636_v51 }
  0xf4   : > { %834 = vmatpush2.bf16.msra.mxu0 %v571_v56 }
  0xf5   : > { %887 = vmatpush2.bf16.msra.mxu1 %v635_v57  ;;  %835 = vmatprep.subr.bf16.mxu0 %v568_v58  ;;  %v651_v57 = vld [vmem:[#allocation2 + $0x58] sm:$0xff] }
  0xf6   : > { %888 = vmatprep.subr.bf16.mxu1 %v632_v59 }
  0xf8   : > { %836 = vmatpush2.bf16.msra.mxu0 %v567_v0 }
  0xf9   : > { %889 = vmatpush2.bf16.msra.mxu1 %v631_v1  ;;  %837 = vmatprep.subr.bf16.mxu0 %v564_v2 }
  0xfa   : > { %890 = vmatprep.subr.bf16.mxu1 %v628_v3 }
  0xfc   : > { %838 = vmatpush2.bf16.msra.mxu0 %v563_v6 }
  0xfd   : > { %891 = vmatpush2.bf16.msra.mxu1 %v627_v7  ;;  %839 = vmatprep.subr.bf16.mxu0 %v560_v8 }
  0xfe   : > { %892 = vmatprep.subr.bf16.mxu1 %v624_v9  ;;  %v656_v9 = vld [vmem:[#allocation2 + $0x48] sm:$0xff] }
 0x100   : > { %840 = vmatpush2.bf16.msra.mxu0 %v559_v12 }
 0x101   : > { %893 = vmatpush2.bf16.msra.mxu1 %v623_v13  ;;  %841 = vmatprep.subr.bf16.mxu0 %v556_v14  ;;  %v659_v14 = vld [vmem:[#allocation2 + $0x10] sm:$0xff] }
 0x102   : > { %894 = vmatprep.subr.bf16.mxu1 %v620_v15 }
 0x104   : > { %842 = vmatpush2.bf16.msra.mxu0 %v555_v16 }
 0x105   : > { %895 = vmatpush2.bf16.msra.mxu1 %v619_v17 }
 0x107   : > { %844 = vmatmul.mubr.bf16.vlgmr.msra.gmra.mxu0 %v3600_v44 }
 0x108   : > { %897 = vmatmul.mubr.bf16.vlgmr.msra.gmra.mxu1 %v3603_v45  ;;  %853 = vmatprep.mubr.bf16.mxu0 %v3608_v52 }
 0x109   : > { %906 = vmatprep.mubr.bf16.mxu1 %v3611_v53 }
 0x10f   : > { %854 = vmatmul.mubr.bf16.gmra.mxu0 %v3620_v60 }
 0x110   : > { %907 = vmatmul.mubr.bf16.gmra.mxu1 %v3623_v61 }
 0x187   : > { %v739_v26 = vpop.f32.mrf.mxu0 }
 0x188   : > { %v792_v18 = vpop.f32.mrf.mxu1 }
 0x189   : > { %v793_v19 = vadd.f32 %v792_v18, %v739_v26  ;;  %v741_v20 = vpop.f32.mrf.mxu0 }
 0x18a   : > { %v794_v22 = vpop.f32.mrf.mxu1 }
 0x18b   : > { %v917_v23 = vadd.f32 %v793_v19, %v649_v33  ;;  %v795_v24 = vadd.f32 %v794_v22, %v741_v20  ;;  %v743_v44 = vpop.f32.mrf.mxu0  ;;  %v660_v33 = vld [vmem:[#allocation2 + $0x38] sm:$0xff] }
 0x18c   : > { %v796_v45 = vpop.f32.mrf.mxu1  ;;  %v663_v22 = vld [vmem:[#allocation2 + $0x78] sm:$0xff] }
 0x18d   : > { %933 = vst [vmem:[#allocation2 + $0x30] sm:$0xff] %v917_v23  ;;  %v918_v52 = vadd.f32 %v795_v24, %v650_v21  ;;  %v797_v27 = vadd.f32 %v796_v45, %v743_v44  ;;  %v745_v53 = vpop.f32.mrf.mxu0  ;;  %v664_v45 = vld [vmem:[#allocation2 + $0x28] sm:$0xff] }
 0x18e   : > { %v798_v60 = vpop.f32.mrf.mxu1 }
 0x18f   : > { %934 = vst [vmem:[#allocation2] sm:$0xff] %v918_v52  ;;  %v921_v61 = vadd.f32 %v797_v27, %v653_v25  ;;  %v799_v29 = vadd.f32 %v798_v60, %v745_v53  ;;  %v749_v30 = vpop.f32.mrf.mxu0 }
 0x190   : > { %v802_v32 = vpop.f32.mrf.mxu1 }
 0x191   : > { %937 = vst [vmem:[#allocation2 + $0x50] sm:$0xff] %v921_v61  ;;  %v922_v34 = vadd.f32 %v799_v29, %v654_v28  ;;  %v803_v35 = vadd.f32 %v802_v32, %v749_v30  ;;  %v751_v36 = vpop.f32.mrf.mxu0 }
 0x192   : > { %v804_v38 = vpop.f32.mrf.mxu1 }
 0x193   : > { %938 = vst [vmem:[#allocation2 + $0x68] sm:$0xff] %v922_v34  ;;  %v925_v39 = vadd.f32 %v803_v35, %v657_v31  ;;  %v805_v40 = vadd.f32 %v804_v38, %v751_v36  ;;  %v753_v41 = vpop.f32.mrf.mxu0 }
 0x194   : > { %v806_v43 = vpop.f32.mrf.mxu1 }
 0x195   : > { %941 = vst [vmem:[#allocation2 + $0x40] sm:$0xff] %v925_v39  ;;  %v926_v46 = vadd.f32 %v805_v40, %v658_v37  ;;  %v807_v47 = vadd.f32 %v806_v43, %v753_v41  ;;  %v755_v48 = vpop.f32.mrf.mxu0 }
 0x196   : > { %v808_v50 = vpop.f32.mrf.mxu1 }
 0x197   : > { %942 = vst [vmem:[#allocation2 + $0x20] sm:$0xff] %v926_v46  ;;  %v929_v51 = vadd.f32 %v807_v47, %v661_v42  ;;  %v809_v54 = vadd.f32 %v808_v50, %v755_v48 }
 0x199   : > { %945 = vst [vmem:[#allocation2 + $0x60] sm:$0xff] %v929_v51  ;;  %v930_v55 = vadd.f32 %v809_v54, %v662_v49 }
 0x19b   : > { %946 = vst [vmem:[#allocation2 + $0x70] sm:$0xff] %v930_v55 }
 0x1c7   : > { %v845_v56 = vpop.f32.mrf.mxu0 }
 0x1c8   : > { %v898_v58 = vpop.f32.mrf.mxu1 }
 0x1c9   : > { %v899_v59 = vadd.f32 %v898_v58, %v845_v56  ;;  %v847_v62 = vpop.f32.mrf.mxu0 }
 0x1ca   : > { %v900_v0 = vpop.f32.mrf.mxu1 }
 0x1cb   : > { %v919_v1 = vadd.f32 %v899_v59, %v651_v57  ;;  %v901_v2 = vadd.f32 %v900_v0, %v847_v62  ;;  %v849_v3 = vpop.f32.mrf.mxu0 }
 0x1cc   : > { %v902_v5 = vpop.f32.mrf.mxu1 }
 0x1cd   : > { %935 = vst [vmem:[#allocation2 + $0x58] sm:$0xff] %v919_v1  ;;  %v920_v6 = vadd.f32 %v901_v2, %v652_v63  ;;  %v903_v7 = vadd.f32 %v902_v5, %v849_v3  ;;  %v851_v8 = vpop.f32.mrf.mxu0 }
 0x1ce   : > { %v904_v10 = vpop.f32.mrf.mxu1 }
 0x1cf   : > { %936 = vst [vmem:[#allocation2 + $0x18] sm:$0xff] %v920_v6  ;;  %v923_v11 = vadd.f32 %v903_v7, %v655_v4  ;;  %v905_v12 = vadd.f32 %v904_v10, %v851_v8  ;;  %v855_v13 = vpop.f32.mrf.mxu0 }
 0x1d0   : > { %v908_v15 = vpop.f32.mrf.mxu1 }
 0x1d1   : > { %939 = vst [vmem:[#allocation2 + $0x8] sm:$0xff] %v923_v11  ;;  %v924_v16 = vadd.f32 %v905_v12, %v656_v9  ;;  %v909_v17 = vadd.f32 %v908_v15, %v855_v13  ;;  %v857_v26 = vpop.f32.mrf.mxu0 }
 0x1d2   : > { %v910_v18 = vpop.f32.mrf.mxu1 }
 0x1d3   : > { %940 = vst [vmem:[#allocation2 + $0x48] sm:$0xff] %v924_v16  ;;  %v927_v19 = vadd.f32 %v909_v17, %v659_v14  ;;  %v911_v20 = vadd.f32 %v910_v18, %v857_v26  ;;  %v859_v21 = vpop.f32.mrf.mxu0 }
 0x1d4   : > { %v912_v23 = vpop.f32.mrf.mxu1 }
 0x1d5   : > { %943 = vst [vmem:[#allocation2 + $0x10] sm:$0xff] %v927_v19  ;;  %v928_v24 = vadd.f32 %v911_v20, %v660_v33  ;;  %v913_v44 = vadd.f32 %v912_v23, %v859_v21  ;;  %v861_v25 = vpop.f32.mrf.mxu0 }
 0x1d6   : > { %v914_v52 = vpop.f32.mrf.mxu1 }
 0x1d7   : > { %944 = vst [vmem:[#allocation2 + $0x38] sm:$0xff] %v928_v24  ;;  %v931_v27 = vadd.f32 %v913_v44, %v663_v22  ;;  %v915_v53 = vadd.f32 %v914_v52, %v861_v25  ;;  %952 = sbr.rel (%p2604_p0) target bundleno = 1169 (0x491), region = 88 }
 0x1d9   : > { %947 = vst [vmem:[#allocation2 + $0x78] sm:$0xff] %v931_v27  ;;  %v932_v28 = vadd.f32 %v915_v53, %v664_v45 }
 0x1db   : > { %948 = vst [vmem:[#allocation2 + $0x28] sm:$0xff] %v932_v28 }
 0x1dc   : > { %v2928_v60 = vld [vmem:[#allocation9 + $0xe4] ss:$16 sps:$4 sm:$0xff]   ;;  %v2932_v29 = vld [vmem:[#allocation9 + $0xe0] ss:$16 sps:$4 sm:$0xff]   ;;  %v971_v7 = vlaneseq  ;;  %v969_v22 = vld [vmem:[%s3799_s2] sm:$0xf] }
 0x1dd   : > { %v2930_v61 = vld [vmem:[#allocation9 + $0x2e4] ss:$16 sps:$4 sm:$0xff]   ;;  %1859 = vmatprep.subr.bf16.mxu0 %v2928_v60  ;;  %v2933_v30 = vld [vmem:[#allocation9 + $0x2e0] ss:$16 sps:$4 sm:$0xff]   ;;  %v1007_v23 = vld [vmem:[#allocation8] sm:$0xf] }
 0x1de   : > { %1912 = vmatprep.subr.bf16.mxu1 %v2930_v61  ;;  %v2934_v31 = vld [vmem:[#allocation9 + $0xc4] ss:$16 sps:$4 sm:$0xff]   ;;  %1860 = vmatpush1.bf16.msra.mxu0 %v2932_v29  ;;  %v2938_v34 = vld [vmem:[#allocation9 + $0xc0] ss:$16 sps:$4 sm:$0xff]   ;;  %v972_v12 = vshrl.u32 %v971_v7, 7  ;;  %vm2490_vm0 = vcmask 7168  }
 0x1df   : > { %1913 = vmatpush1.bf16.msra.mxu1 %v2933_v30  ;;  %v2936_v32 = vld [vmem:[#allocation9 + $0x2c4] ss:$16 sps:$4 sm:$0xff]   ;;  %1861 = vmatprep.subr.bf16.mxu0 %v2934_v31  ;;  %v2939_v35 = vld [vmem:[#allocation9 + $0x2c0] ss:$16 sps:$4 sm:$0xff]  }
 0x1e0   : > { %1914 = vmatprep.subr.bf16.mxu1 %v2936_v32  ;;  %v2940_v36 = vld [vmem:[#allocation9 + $0xa4] ss:$16 sps:$4 sm:$0xff]   ;;  %v2944_v38 = vld [vmem:[#allocation9 + $0xa0] ss:$16 sps:$4 sm:$0xff]   ;;  %v3660_v17 = vsub.s32 1, %v972_v12  ;;  %v3662_v26 = vsub.s32 3, %v972_v12 }
 0x1e1   : > { %v2942_v37 = vld [vmem:[#allocation9 + $0x2a4] ss:$16 sps:$4 sm:$0xff]   ;;  %v2945_v39 = vld [vmem:[#allocation9 + $0x2a0] ss:$16 sps:$4 sm:$0xff]   ;;  %v3664_v18 = vsub.s32 0, %v972_v12  ;;  %v3669_v24 = vsub.s32 2, %v972_v12 }
 0x1e2   : > { %1862 = vmatpush1.bf16.msra.mxu0 %v2938_v34  ;;  %v2946_v40 = vld [vmem:[#allocation9 + $0x84] ss:$16 sps:$4 sm:$0xff]   ;;  %v2950_v42 = vld [vmem:[#allocation9 + $0x80] ss:$16 sps:$4 sm:$0xff]   ;;  %v3672_v25 = vrot.slane %v969_v22, %v3660_v17  ;;  %v3675_v45 = vrot.slane %v1007_v23, %v3660_v17  ;;  %v3678_v53 = vrot.slane %v969_v22, %v3662_v26  ;;  %v3681_v61 = vrot.slane %v1007_v23, %v3662_v26 }
 0x1e3   : > { %1915 = vmatpush1.bf16.msra.mxu1 %v2939_v35  ;;  %1863 = vmatprep.subr.bf16.mxu0 %v2940_v36  ;;  %v2948_v41 = vld [vmem:[#allocation9 + $0x284] ss:$16 sps:$4 sm:$0xff]   ;;  %v2951_v43 = vld [vmem:[#allocation9 + $0x280] ss:$16 sps:$4 sm:$0xff]   ;;  %v3684_v29 = vrot.slane %v969_v22, %v3664_v18 }
 0x1e4   : > { %1916 = vmatprep.subr.bf16.mxu1 %v2942_v37  ;;  %v2952_v46 = vld [vmem:[#allocation9 + $0x64] ss:$16 sps:$4 sm:$0xff]   ;;  %v2956_v48 = vld [vmem:[#allocation9 + $0x60] ss:$16 sps:$4 sm:$0xff]  }
 0x1e5   : > { %v2954_v47 = vld [vmem:[#allocation9 + $0x264] ss:$16 sps:$4 sm:$0xff]   ;;  %v2957_v49 = vld [vmem:[#allocation9 + $0x260] ss:$16 sps:$4 sm:$0xff]  }
 0x1e6   : > { %1864 = vmatpush1.bf16.msra.mxu0 %v2944_v38  ;;  %v2958_v50 = vld [vmem:[#allocation9 + $0x44] ss:$16 sps:$4 sm:$0xff]   ;;  %v2962_v54 = vld [vmem:[#allocation9 + $0x40] ss:$16 sps:$4 sm:$0xff]  }
 0x1e7   : > { %1917 = vmatpush1.bf16.msra.mxu1 %v2945_v39  ;;  %1865 = vmatprep.subr.bf16.mxu0 %v2946_v40  ;;  %v2960_v51 = vld [vmem:[#allocation9 + $0x244] ss:$16 sps:$4 sm:$0xff]   ;;  %v2963_v55 = vld [vmem:[#allocation9 + $0x240] ss:$16 sps:$4 sm:$0xff]   ;;  %v3691_v39 = vrot.slane %v969_v22, %v3669_v24  ;;  %v3029_v22 = vld [vmem:[#allocation9 + $0x2ec] ss:$16 sps:$4 sm:$0xff]  }
 0x1e8   : > { %1918 = vmatprep.subr.bf16.mxu1 %v2948_v41  ;;  %v2964_v56 = vld [vmem:[#allocation9 + $0x24] ss:$16 sps:$4 sm:$0xff]   ;;  %v2968_v58 = vld [vmem:[#allocation9 + $0x20] ss:$16 sps:$4 sm:$0xff]  }
 0x1e9   : > { %v2966_v57 = vld [vmem:[#allocation9 + $0x224] ss:$16 sps:$4 sm:$0xff]   ;;  %v2969_v59 = vld [vmem:[#allocation9 + $0x220] ss:$16 sps:$4 sm:$0xff]  }
 0x1ea   : > { %1866 = vmatpush1.bf16.msra.mxu0 %v2950_v42  ;;  %v2970_v62 = vld [vmem:[#allocation9 + $0x4] ss:$16 sps:$4 sm:$0xff]   ;;  %v2974_v0 = vld [vmem:[#allocation9] ss:$16 sps:$4 sm:$0xff]  }
 0x1eb   : > { %1919 = vmatpush1.bf16.msra.mxu1 %v2951_v43  ;;  %1867 = vmatprep.subr.bf16.mxu0 %v2952_v46  ;;  %v2972_v63 = vld [vmem:[#allocation9 + $0x204] ss:$16 sps:$4 sm:$0xff]   ;;  %v2975_v1 = vld [vmem:[#allocation9 + $0x200] ss:$16 sps:$4 sm:$0xff]  }
 0x1ec   : > { %1920 = vmatprep.subr.bf16.mxu1 %v2954_v47  ;;  %v2976_v2 = vld [vmem:[#allocation9 + $0x1e4] ss:$16 sps:$4 sm:$0xff]   ;;  %v2980_v4 = vld [vmem:[#allocation9 + $0x1e0] ss:$16 sps:$4 sm:$0xff]  }
 0x1ed   : > { %v2978_v3 = vld [vmem:[#allocation9 + $0x3e4] ss:$16 sps:$4 sm:$0xff]   ;;  %v2981_v5 = vld [vmem:[#allocation9 + $0x3e0] ss:$16 sps:$4 sm:$0xff]  }
 0x1ee   : > { %1868 = vmatpush1.bf16.msra.mxu0 %v2956_v48  ;;  %v2982_v6 = vld [vmem:[#allocation9 + $0x1c4] ss:$16 sps:$4 sm:$0xff]   ;;  %v2986_v9 = vld [vmem:[#allocation9 + $0x1c0] ss:$16 sps:$4 sm:$0xff]  }
 0x1ef   : > { %1921 = vmatpush1.bf16.msra.mxu1 %v2957_v49  ;;  %1869 = vmatprep.subr.bf16.mxu0 %v2958_v50  ;;  %v2984_v8 = vld [vmem:[#allocation9 + $0x3c4] ss:$16 sps:$4 sm:$0xff]   ;;  %v2987_v10 = vld [vmem:[#allocation9 + $0x3c0] ss:$16 sps:$4 sm:$0xff]  }
 0x1f0   : > { %1922 = vmatprep.subr.bf16.mxu1 %v2960_v51  ;;  %v2988_v11 = vld [vmem:[#allocation9 + $0x1a4] ss:$16 sps:$4 sm:$0xff]   ;;  %v2992_v14 = vld [vmem:[#allocation9 + $0x1a0] ss:$16 sps:$4 sm:$0xff]   ;;  %v3699_v51 = vrot.slane %v1007_v23, %v3664_v18 }
 0x1f1   : > { %v2990_v13 = vld [vmem:[#allocation9 + $0x3a4] ss:$16 sps:$4 sm:$0xff]   ;;  %v2993_v15 = vld [vmem:[#allocation9 + $0x3a0] ss:$16 sps:$4 sm:$0xff]  }
 0x1f2   : > { %1870 = vmatpush1.bf16.msra.mxu0 %v2962_v54  ;;  %v2994_v16 = vld [vmem:[#allocation9 + $0x184] ss:$16 sps:$4 sm:$0xff]   ;;  %v2998_v19 = vld [vmem:[#allocation9 + $0x180] ss:$16 sps:$4 sm:$0xff]  }
 0x1f3   : > { %1923 = vmatpush1.bf16.msra.mxu1 %v2963_v55  ;;  %1871 = vmatprep.subr.bf16.mxu0 %v2964_v56  ;;  %v2996_v33 = vld [vmem:[#allocation9 + $0x384] ss:$16 sps:$4 sm:$0xff]   ;;  %v954_v20 = vld [vmem:[#allocation2] sm:$0xff]  ;;  %v953_v37 = vld [vmem:[#allocation2 + $0x30] sm:$0xff] }
 0x1f4   : > { %1924 = vmatprep.subr.bf16.mxu1 %v2966_v57  ;;  %v958_v21 = vld [vmem:[#allocation2 + $0x68] sm:$0xff]  ;;  %v956_v52 = vld [vmem:[#allocation2 + $0x18] sm:$0xff]  ;;  %v992_v32 = vmul.f32 %v3672_v25, %v954_v20  ;;  %v957_v38 = vld [vmem:[#allocation2 + $0x50] sm:$0xff]  ;;  %v991_v50 = vmul.f32 %v3684_v29, %v953_v37 }
 0x1f5   : > { %v2999_v44 = vld [vmem:[#allocation9 + $0x380] ss:$16 sps:$4 sm:$0xff]   ;;  %v3000_v28 = vld [vmem:[#allocation9 + $0x164] ss:$16 sps:$4 sm:$0xff]   ;;  %v996_v34 = vmul.f32 %v3672_v25, %v958_v21  ;;  %v994_v35 = vmul.f32 %v3678_v53, %v956_v52  ;;  %v995_v57 = vmul.f32 %v3684_v29, %v957_v38  ;;  %v3026_v21 = vld [vmem:[#allocation9 + $0xec] ss:$16 sps:$4 sm:$0xff]  }
 0x1f6   : > { %1872 = vmatpush1.bf16.msra.mxu0 %v2968_v58  ;;  %v960_v27 = vld [vmem:[#allocation2 + $0x48] sm:$0xff]  ;;  %v1030_v40 = vadd.f32 %v3675_v45, %v992_v32  ;;  %v955_v43 = vld [vmem:[#allocation2 + $0x58] sm:$0xff]  ;;  %v1029_v7 = vadd.f32 %v3699_v51, %v991_v50  ;;  %v3038_v32 = vld [vmem:[#allocation9 + $0xac] ss:$16 sps:$4 sm:$0xff]  }
 0x1f7   : > { %1925 = vmatpush1.bf16.msra.mxu1 %v2969_v59  ;;  %1873 = vmatprep.subr.bf16.mxu0 %v2970_v62  ;;  %v3002_v60 = vld [vmem:[#allocation9 + $0x364] ss:$16 sps:$4 sm:$0xff]   ;;  %v3004_v30 = vld [vmem:[#allocation9 + $0x160] ss:$16 sps:$4 sm:$0xff]   ;;  %v998_v36 = vmul.f32 %v3678_v53, %v960_v27  ;;  %v1034_v41 = vadd.f32 %v3675_v45, %v996_v34  ;;  %v1032_v42 = vadd.f32 %v3681_v61, %v994_v35  ;;  %v3024_v52 = vld [vmem:[#allocation9 + $0xe8] ss:$16 sps:$4 sm:$0xff]  }
 0x1f8   : > { %1926 = vmatprep.subr.bf16.mxu1 %v2972_v63  ;;  %v3005_v31 = vld [vmem:[#allocation9 + $0x360] ss:$16 sps:$4 sm:$0xff]   ;;  %v3006_v47 = vld [vmem:[#allocation9 + $0x144] ss:$16 sps:$4 sm:$0xff]   ;;  %v1046_v54 = vmax.f32 %v1030_v40, 0.0  ;;  %v993_v59 = vmul.f32 %v3691_v39, %v955_v43  ;;  %v3705_v63 = vrot.slane %v1007_v23, %v3669_v24 }
 0x1f9   : > { %v959_v46 = vld [vmem:[#allocation2 + $0x8] sm:$0xff]  ;;  %v1036_v49 = vadd.f32 %v3681_v61, %v998_v36  ;;  %v1050_v55 = vmax.f32 %v1034_v41, 0.0  ;;  %v1048_v56 = vmax.f32 %v1032_v42, 0.0  ;;  %v3041_v34 = vld [vmem:[#allocation9 + $0x2ac] ss:$16 sps:$4 sm:$0xff]  }
 0x1fa   : > { %1874 = vmatpush1.bf16.msra.mxu0 %v2974_v0  ;;  %v3008_v48 = vld [vmem:[#allocation9 + $0x344] ss:$16 sps:$4 sm:$0xff]   ;;  %v997_v62 = vmul.f32 %v3691_v39, %v959_v46  ;;  %v3010_v0 = vld [vmem:[#allocation9 + $0x140] ss:$16 sps:$4 sm:$0xff]   ;;  %v3027_v27 = vld [vmem:[#allocation9 + $0x2e8] ss:$16 sps:$4 sm:$0xff]  }
 0x1fb   : > { %1927 = vmatpush1.bf16.msra.mxu1 %v2975_v1  ;;  %1875 = vmatprep.subr.bf16.mxu0 %v2976_v2  ;;  %v1052_v58 = vmax.f32 %v1036_v49, 0.0  ;;  %v3011_v1 = vld [vmem:[#allocation9 + $0x340] ss:$16 sps:$4 sm:$0xff]   ;;  %v3012_v2 = vld [vmem:[#allocation9 + $0x124] ss:$16 sps:$4 sm:$0xff]  }
 0x1fc   : > { %1928 = vmatprep.subr.bf16.mxu1 %v2978_v3  ;;  %v3707_v3 = vpack.c.bf16 %v1050_v55, %v1046_v54  ;;  %v3018_v12 = vld [vmem:[#allocation9 + $0x104] ss:$16 sps:$4 sm:$0xff]   ;;  %v3023_v20 = vld [vmem:[#allocation9 + $0x300] ss:$16 sps:$4 sm:$0xff]   ;;  %v3036_v35 = vld [vmem:[#allocation9 + $0xa8] ss:$16 sps:$4 sm:$0xff]  }
 0x1fd   : > { %v3039_v36 = vld [vmem:[#allocation9 + $0x2a8] ss:$16 sps:$4 sm:$0xff]   ;;  %v3044_v37 = vld [vmem:[#allocation9 + $0x8c] ss:$16 sps:$4 sm:$0xff]  }
 0x1fe   : > { %1876 = vmatpush2.bf16.msra.mxu0 %v2980_v4  ;;  %v3014_v4 = vld [vmem:[#allocation9 + $0x324] ss:$16 sps:$4 sm:$0xff]   ;;  %1891 = vmatprep.mubr.bf16.mxu0 %v3707_v3  ;;  %v3047_v38 = vld [vmem:[#allocation9 + $0x28c] ss:$16 sps:$4 sm:$0xff]   ;;  %v3042_v40 = vld [vmem:[#allocation9 + $0x88] ss:$16 sps:$4 sm:$0xff]  }
 0x1ff   : > { %1929 = vmatpush2.bf16.msra.mxu1 %v2981_v5  ;;  %1877 = vmatprep.subr.bf16.mxu0 %v2982_v6  ;;  %v3709_v5 = vpack.c.bf16 %v1052_v58, %v1048_v56  ;;  %v3016_v6 = vld [vmem:[#allocation9 + $0x120] ss:$16 sps:$4 sm:$0xff]   ;;  %v3045_v41 = vld [vmem:[#allocation9 + $0x288] ss:$16 sps:$4 sm:$0xff]   ;;  %v3050_v42 = vld [vmem:[#allocation9 + $0x6c] ss:$16 sps:$4 sm:$0xff]  }
 0x200   : > { %1930 = vmatprep.subr.bf16.mxu1 %v2984_v8  ;;  %v1033_v8 = vadd.f32 %v3699_v51, %v995_v57  ;;  %v3053_v43 = vld [vmem:[#allocation9 + $0x26c] ss:$16 sps:$4 sm:$0xff]   ;;  %v964_v57 = vld [vmem:[#allocation2 + $0x38] sm:$0xff]  ;;  %v968_v58 = vld [vmem:[#allocation2 + $0x28] sm:$0xff] }
 0x201   : > { %1944 = vmatprep.mubr.bf16.mxu1 %v3709_v5  ;;  %v962_v46 = vld [vmem:[#allocation2 + $0x20] sm:$0xff] }
 0x202   : > { %1878 = vmatpush2.bf16.msra.mxu0 %v2986_v9  ;;  %v1031_v9 = vadd.f32 %v3705_v63, %v993_v59  ;;  %v961_v49 = vld [vmem:[#allocation2 + $0x40] sm:$0xff] }
 0x203   : > { %1931 = vmatpush2.bf16.msra.mxu1 %v2987_v10  ;;  %1879 = vmatprep.subr.bf16.mxu0 %v2988_v11  ;;  %v1035_v10 = vadd.f32 %v3705_v63, %v997_v62  ;;  %v3017_v11 = vld [vmem:[#allocation9 + $0x320] ss:$16 sps:$4 sm:$0xff]   ;;  %v999_v55 = vmul.f32 %v3684_v29, %v961_v49  ;;  %v3048_v59 = vld [vmem:[#allocation9 + $0x68] ss:$16 sps:$4 sm:$0xff]  }
 0x204   : > { %1932 = vmatprep.subr.bf16.mxu1 %v2990_v13  ;;  %v3020_v13 = vld [vmem:[#allocation9 + $0x304] ss:$16 sps:$4 sm:$0xff]   ;;  %v965_v50 = vld [vmem:[#allocation2 + $0x60] sm:$0xff] }
 0x205   : > { %v1003_v56 = vmul.f32 %v3684_v29, %v965_v50  ;;  %v3051_v62 = vld [vmem:[#allocation9 + $0x268] ss:$16 sps:$4 sm:$0xff]   ;;  %v3059_v29 = vld [vmem:[#allocation9 + $0x24c] ss:$16 sps:$4 sm:$0xff]  }
 0x206   : > { %1880 = vmatpush2.bf16.msra.mxu0 %v2992_v14  ;;  %v3022_v14 = vld [vmem:[#allocation9 + $0x100] ss:$16 sps:$4 sm:$0xff]   ;;  %v3087_v49 = vld [vmem:[#allocation9 + $0x3a8] ss:$16 sps:$4 sm:$0xff]   ;;  %v3092_v50 = vld [vmem:[#allocation9 + $0x18c] ss:$16 sps:$4 sm:$0xff]  }
 0x207   : > { %1933 = vmatpush2.bf16.msra.mxu1 %v2993_v15  ;;  %1881 = vmatprep.subr.bf16.mxu0 %v2994_v16  ;;  %v1045_v15 = vmax.f32 %v1029_v7, 0.0  ;;  %v1049_v16 = vmax.f32 %v1033_v8, 0.0  ;;  %v1037_v7 = vadd.f32 %v3699_v51, %v999_v55  ;;  %v3090_v55 = vld [vmem:[#allocation9 + $0x188] ss:$16 sps:$4 sm:$0xff]  }
 0x208   : > { %1934 = vmatprep.subr.bf16.mxu1 %v2996_v33  ;;  %v1047_v33 = vmax.f32 %v1031_v9, 0.0 }
 0x209   : > { %v3717_v23 = vpack.c.bf16 %v1049_v16, %v1045_v15 }
 0x20a   : > { %1882 = vmatpush2.bf16.msra.mxu0 %v2998_v19  ;;  %v1051_v19 = vmax.f32 %v1035_v10, 0.0 }
 0x20b   : > { %1935 = vmatpush2.bf16.msra.mxu1 %v2999_v44  ;;  %1883 = vmatprep.subr.bf16.mxu0 %v3000_v28  ;;  %v3032_v28 = vld [vmem:[#allocation9 + $0xcc] ss:$16 sps:$4 sm:$0xff]  }
 0x20c   : > { %1936 = vmatprep.subr.bf16.mxu1 %v3002_v60  ;;  %v3719_v44 = vpack.c.bf16 %v1051_v19, %v1047_v33  ;;  %v3035_v60 = vld [vmem:[#allocation9 + $0x2cc] ss:$16 sps:$4 sm:$0xff]   ;;  %v3054_v33 = vld [vmem:[#allocation9 + $0x48] ss:$16 sps:$4 sm:$0xff]  }
 0x20d   : > { %v3057_v19 = vld [vmem:[#allocation9 + $0x248] ss:$16 sps:$4 sm:$0xff]  }
 0x20e   : > { %1884 = vmatpush2.bf16.msra.mxu0 %v3004_v30  ;;  %v3030_v30 = vld [vmem:[#allocation9 + $0xc8] ss:$16 sps:$4 sm:$0xff]  }
 0x20f   : > { %1937 = vmatpush2.bf16.msra.mxu1 %v3005_v31  ;;  %1885 = vmatprep.subr.bf16.mxu0 %v3006_v47  ;;  %v3033_v31 = vld [vmem:[#allocation9 + $0x2c8] ss:$16 sps:$4 sm:$0xff]  }
 0x210   : > { %1938 = vmatprep.subr.bf16.mxu1 %v3008_v48  ;;  %v966_v47 = vld [vmem:[#allocation2 + $0x70] sm:$0xff]  ;;  %v1000_v48 = vmul.f32 %v3672_v25, %v962_v46 }
 0x211   : > { %v1004_v54 = vmul.f32 %v3672_v25, %v966_v47  ;;  %v1041_v25 = vadd.f32 %v3699_v51, %v1003_v56  ;;  %v3078_v46 = vld [vmem:[#allocation9 + $0x1c8] ss:$16 sps:$4 sm:$0xff]   ;;  %v3086_v47 = vld [vmem:[#allocation9 + $0x1ac] ss:$16 sps:$4 sm:$0xff]  }
 0x212   : > { %1886 = vmatpush2.bf16.msra.mxu0 %v3010_v0  ;;  %v1038_v0 = vadd.f32 %v3675_v45, %v1000_v48  ;;  %v3084_v48 = vld [vmem:[#allocation9 + $0x1a8] ss:$16 sps:$4 sm:$0xff]  }
 0x213   : > { %1939 = vmatpush2.bf16.msra.mxu1 %v3011_v1  ;;  %1887 = vmatprep.subr.bf16.mxu0 %v3012_v2  ;;  %v1002_v1 = vmul.f32 %v3678_v53, %v964_v57  ;;  %v1006_v2 = vmul.f32 %v3678_v53, %v968_v58  ;;  %v3093_v56 = vld [vmem:[#allocation9 + $0x388] ss:$16 sps:$4 sm:$0xff]   ;;  %v3098_v57 = vld [vmem:[#allocation9 + $0x16c] ss:$16 sps:$4 sm:$0xff]  }
 0x214   : > { %1940 = vmatprep.subr.bf16.mxu1 %v3014_v4  ;;  %v3056_v4 = vld [vmem:[#allocation9 + $0x4c] ss:$16 sps:$4 sm:$0xff]   ;;  %v1054_v8 = vmax.f32 %v1038_v0, 0.0 }
 0x215   : > { %v1040_v9 = vadd.f32 %v3681_v61, %v1002_v1  ;;  %v1044_v10 = vadd.f32 %v3681_v61, %v1006_v2  ;;  %v3101_v58 = vld [vmem:[#allocation9 + $0x36c] ss:$16 sps:$4 sm:$0xff]   ;;  %v3102_v2 = vld [vmem:[#allocation9 + $0x148] ss:$16 sps:$4 sm:$0xff]  }
 0x216   : > { %1888 = vmatpush2.bf16.msra.mxu0 %v3016_v6  ;;  %v1042_v6 = vadd.f32 %v3675_v45, %v1004_v54  ;;  %v3095_v54 = vld [vmem:[#allocation9 + $0x38c] ss:$16 sps:$4 sm:$0xff]  }
 0x217   : > { %1941 = vmatpush2.bf16.msra.mxu1 %v3017_v11  ;;  %1889 = vmatprep.subr.bf16.mxu0 %v3018_v12  ;;  %v963_v11 = vld [vmem:[#allocation2 + $0x10] sm:$0xff]  ;;  %v967_v12 = vld [vmem:[#allocation2 + $0x78] sm:$0xff]  ;;  %v1056_v15 = vmax.f32 %v1040_v9, 0.0  ;;  %v1060_v16 = vmax.f32 %v1044_v10, 0.0 }
 0x218   : > { %1942 = vmatprep.subr.bf16.mxu1 %v3020_v13  ;;  %v1058_v53 = vmax.f32 %v1042_v6, 0.0  ;;  %v1053_v13 = vmax.f32 %v1037_v7, 0.0  ;;  %v1001_v45 = vmul.f32 %v3691_v39, %v963_v11  ;;  %v1005_v51 = vmul.f32 %v3691_v39, %v967_v12  ;;  %v3104_v0 = vld [vmem:[#allocation9 + $0x14c] ss:$16 sps:$4 sm:$0xff]   ;;  %v3114_v10 = vld [vmem:[#allocation9 + $0x108] ss:$16 sps:$4 sm:$0xff]  }
 0x219   : > { %v3107_v1 = vld [vmem:[#allocation9 + $0x34c] ss:$16 sps:$4 sm:$0xff]   ;;  %v3117_v11 = vld [vmem:[#allocation9 + $0x308] ss:$16 sps:$4 sm:$0xff]  }
 0x21a   : > { %1890 = vmatpush2.bf16.msra.mxu0 %v3022_v14  ;;  %v1057_v14 = vmax.f32 %v1041_v25, 0.0  ;;  %v1039_v61 = vadd.f32 %v3705_v63, %v1001_v45  ;;  %v3110_v6 = vld [vmem:[#allocation9 + $0x12c] ss:$16 sps:$4 sm:$0xff]   ;;  %v3108_v25 = vld [vmem:[#allocation9 + $0x128] ss:$16 sps:$4 sm:$0xff]  }
 0x21b   : > { %1943 = vmatpush2.bf16.msra.mxu1 %v3023_v20  ;;  %1965 = vmatprep.subr.bf16.mxu0 %v3026_v21  ;;  %v3737_v20 = vpack.c.bf16 %v1058_v53, %v1054_v8  ;;  %v3113_v7 = vld [vmem:[#allocation9 + $0x32c] ss:$16 sps:$4 sm:$0xff]  }
 0x21c   : > { %2018 = vmatprep.subr.bf16.mxu1 %v3029_v22  ;;  %v3739_v21 = vpack.c.bf16 %v1057_v14, %v1053_v13  ;;  %v3062_v22 = vld [vmem:[#allocation9 + $0x2c] ss:$16 sps:$4 sm:$0xff]   ;;  %v3122_v13 = vld [vmem:[#allocation11 + $0x70] sm:$0xff]  }
 0x21d   : > { %1892 = vmatmul.mubr.bf16.vlgmr.msra.gmra.mxu0 %v3717_v23  ;;  %v3116_v8 = vld [vmem:[#allocation9 + $0x10c] ss:$16 sps:$4 sm:$0xff]   ;;  %v3123_v14 = vld [vmem:[#allocation11 + $0x30] sm:$0xff]  }
 0x21e   : > { %1945 = vmatmul.mubr.bf16.vlgmr.msra.gmra.mxu1 %v3719_v44  ;;  %1966 = vmatpush1.bf16.msra.mxu0 %v3024_v52  ;;  %v3742_v52 = vpack.c.bf16 %v1060_v16, %v1056_v15  ;;  %v3119_v9 = vld [vmem:[#allocation9 + $0x30c] ss:$16 sps:$4 sm:$0xff]   ;;  %v3126_v16 = vld [vmem:[#allocation11 + $0x60] sm:$0xff]  }
 0x21f   : > { %2019 = vmatpush1.bf16.msra.mxu1 %v3027_v27  ;;  %1967 = vmatprep.subr.bf16.mxu0 %v3032_v28  ;;  %v1043_v27 = vadd.f32 %v3705_v63, %v1005_v51  ;;  %v3065_v28 = vld [vmem:[#allocation9 + $0x22c] ss:$16 sps:$4 sm:$0xff]  }
 0x220   : > { %2020 = vmatprep.subr.bf16.mxu1 %v3035_v60  ;;  %v1055_v60 = vmax.f32 %v1039_v61, 0.0  ;;  %1901 = vmatprep.mubr.bf16.mxu0 %v3737_v20  ;;  %v3071_v63 = vld [vmem:[#allocation9 + $0x20c] ss:$16 sps:$4 sm:$0xff]  }
 0x221   : > { %1954 = vmatprep.mubr.bf16.mxu1 %v3742_v52  ;;  %v1059_v39 = vmax.f32 %v1043_v27, 0.0  ;;  %v3120_v12 = vld [vmem:[#allocation11 + $0x78] sm:$0xff]   ;;  %v3124_v45 = vld [vmem:[#allocation11 + $0x68] sm:$0xff]  }
 0x222   : > { %1968 = vmatpush1.bf16.msra.mxu0 %v3030_v30  ;;  %v3060_v30 = vld [vmem:[#allocation9 + $0x28] ss:$16 sps:$4 sm:$0xff]  }
 0x223   : > { %2021 = vmatpush1.bf16.msra.mxu1 %v3033_v31  ;;  %1969 = vmatprep.subr.bf16.mxu0 %v3038_v32  ;;  %v3063_v31 = vld [vmem:[#allocation9 + $0x228] ss:$16 sps:$4 sm:$0xff]   ;;  %v3068_v32 = vld [vmem:[#allocation9 + $0xc] ss:$16 sps:$4 sm:$0xff]  }
 0x224   : > { %2022 = vmatprep.subr.bf16.mxu1 %v3041_v34  ;;  %v3748_v34 = vpack.c.bf16 %v1059_v39, %v1055_v60  ;;  %v3121_v53 = vld [vmem:[#allocation11 + $0x38] sm:$0xff]   ;;  %v3125_v15 = vld [vmem:[#allocation11 + $0x28] sm:$0xff]   ;;  %v3139_v60 = vld [vmem:[#allocation11 + $0xb0] sm:$0xff]  }
 0x225   : > { %1902 = vmatmul.mubr.bf16.gmra.mxu0 %v3739_v21  ;;  %v3129_v51 = vld [vmem:[#allocation11 + $0x18] sm:$0xff]   ;;  %v3133_v61 = vld [vmem:[#allocation11 + $0x8] sm:$0xff]  }
 0x226   : > { %1970 = vmatpush1.bf16.msra.mxu0 %v3036_v35  ;;  %1955 = vmatmul.mubr.bf16.gmra.mxu1 %v3748_v34  ;;  %v3066_v35 = vld [vmem:[#allocation9 + $0x8] ss:$16 sps:$4 sm:$0xff]  }
 0x227   : > { %2023 = vmatpush1.bf16.msra.mxu1 %v3039_v36  ;;  %1971 = vmatprep.subr.bf16.mxu0 %v3044_v37  ;;  %v3069_v36 = vld [vmem:[#allocation9 + $0x208] ss:$16 sps:$4 sm:$0xff]   ;;  %v3074_v37 = vld [vmem:[#allocation9 + $0x1ec] ss:$16 sps:$4 sm:$0xff]  }
 0x228   : > { %2024 = vmatprep.subr.bf16.mxu1 %v3047_v38  ;;  %1997 = vmatprep.mubr.bf16.mxu0 %v3707_v3  ;;  %v3077_v38 = vld [vmem:[#allocation9 + $0x3ec] ss:$16 sps:$4 sm:$0xff]   ;;  %v3081_v3 = vld [vmem:[#allocation9 + $0x3c8] ss:$16 sps:$4 sm:$0xff]  }
 0x229   : > { %2050 = vmatprep.mubr.bf16.mxu1 %v3709_v5  ;;  %v3089_v5 = vld [vmem:[#allocation9 + $0x3ac] ss:$16 sps:$4 sm:$0xff]  }
 0x22a   : > { %1972 = vmatpush1.bf16.msra.mxu0 %v3042_v40  ;;  %v3072_v40 = vld [vmem:[#allocation9 + $0x1e8] ss:$16 sps:$4 sm:$0xff]  }
 0x22b   : > { %2025 = vmatpush1.bf16.msra.mxu1 %v3045_v41  ;;  %1973 = vmatprep.subr.bf16.mxu0 %v3050_v42  ;;  %v3075_v41 = vld [vmem:[#allocation9 + $0x3e8] ss:$16 sps:$4 sm:$0xff]   ;;  %v3080_v42 = vld [vmem:[#allocation9 + $0x1cc] ss:$16 sps:$4 sm:$0xff]  }
 0x22c   : > { %2026 = vmatprep.subr.bf16.mxu1 %v3053_v43  ;;  %v3083_v43 = vld [vmem:[#allocation9 + $0x3cc] ss:$16 sps:$4 sm:$0xff]  }
 0x22d   : > { %v3137_v27 = vld [vmem:[#allocation11 + $0xb8] sm:$0xff]   ;;  %v3140_v39 = vld [vmem:[#allocation11 + $0xe8] sm:$0xff]  }
 0x22e   : > { %1974 = vmatpush1.bf16.msra.mxu0 %v3048_v59  ;;  %v3096_v59 = vld [vmem:[#allocation9 + $0x168] ss:$16 sps:$4 sm:$0xff]  }
 0x22f   : > { %2027 = vmatpush1.bf16.msra.mxu1 %v3051_v62  ;;  %1975 = vmatprep.subr.bf16.mxu0 %v3056_v4  ;;  %v3099_v62 = vld [vmem:[#allocation9 + $0x368] ss:$16 sps:$4 sm:$0xff]  }
 0x230   : > { %2028 = vmatprep.subr.bf16.mxu1 %v3059_v29  ;;  %v3105_v4 = vld [vmem:[#allocation9 + $0x348] ss:$16 sps:$4 sm:$0xff]  }
 0x231   : > { %v3111_v29 = vld [vmem:[#allocation9 + $0x328] ss:$16 sps:$4 sm:$0xff]  }
 0x232   : > { %1976 = vmatpush1.bf16.msra.mxu0 %v3054_v33  ;;  %v3130_v33 = vld [vmem:[#allocation11 + $0x50] sm:$0xff]  }
 0x233   : > { %2029 = vmatpush1.bf16.msra.mxu1 %v3057_v19  ;;  %1977 = vmatprep.subr.bf16.mxu0 %v3062_v22  ;;  %v3131_v19 = vld [vmem:[#allocation11 + $0x10] sm:$0xff]   ;;  %v3134_v22 = vld [vmem:[#allocation11 + $0x40] sm:$0xff]  }
 0x234   : > { %2030 = vmatprep.subr.bf16.mxu1 %v3065_v28  ;;  %v3138_v28 = vld [vmem:[#allocation11 + $0xf0] sm:$0xff]  }
 0x236   : > { %1978 = vmatpush1.bf16.msra.mxu0 %v3060_v30  ;;  %v3141_v30 = vld [vmem:[#allocation11 + $0xa8] sm:$0xff]  }
 0x237   : > { %2031 = vmatpush1.bf16.msra.mxu1 %v3063_v31  ;;  %1979 = vmatprep.subr.bf16.mxu0 %v3068_v32  ;;  %v3142_v31 = vld [vmem:[#allocation11 + $0xe0] sm:$0xff]  }
 0x238   : > { %2032 = vmatprep.subr.bf16.mxu1 %v3071_v63  ;;  %v3143_v32 = vld [vmem:[#allocation11 + $0xa0] sm:$0xff]   ;;  %v3145_v63 = vld [vmem:[#allocation11 + $0x98] sm:$0xff]  }
 0x23a   : > { %1980 = vmatpush1.bf16.msra.mxu0 %v3066_v35  ;;  %v3146_v35 = vld [vmem:[#allocation11 + $0xd0] sm:$0xff]  }
 0x23b   : > { %2033 = vmatpush1.bf16.msra.mxu1 %v3069_v36  ;;  %1981 = vmatprep.subr.bf16.mxu0 %v3074_v37  ;;  %v3147_v36 = vld [vmem:[#allocation11 + $0x90] sm:$0xff]   ;;  %v3148_v37 = vld [vmem:[#allocation11 + $0xc8] sm:$0xff]  }
 0x23c   : > { %2034 = vmatprep.subr.bf16.mxu1 %v3077_v38  ;;  %v3149_v38 = vld [vmem:[#allocation11 + $0x88] sm:$0xff]  }
 0x23e   : > { %1982 = vmatpush2.bf16.msra.mxu0 %v3072_v40  ;;  %v3150_v40 = vld [vmem:[#allocation11 + $0xc0] sm:$0xff]  }
 0x23f   : > { %2035 = vmatpush2.bf16.msra.mxu1 %v3075_v41  ;;  %1983 = vmatprep.subr.bf16.mxu0 %v3080_v42  ;;  %v3151_v41 = vld [vmem:[#allocation11 + $0x80] sm:$0xff]   ;;  %v1197_v42 = vld [vmem:[%s3802_s5] sm:$0xf] }
 0x240   : > { %2036 = vmatprep.subr.bf16.mxu1 %v3083_v43  ;;  %v1206_v43 = vrot.slane %v1197_v42, %v3660_v17 }
 0x242   : > { %1984 = vmatpush2.bf16.msra.mxu0 %v3078_v46  ;;  %v1202_v46 = vrot.slane %v1197_v42, %v3664_v18 }
 0x243   : > { %2037 = vmatpush2.bf16.msra.mxu1 %v3081_v3  ;;  %1985 = vmatprep.subr.bf16.mxu0 %v3086_v47 }
 0x244   : > { %2038 = vmatprep.subr.bf16.mxu1 %v3089_v5 }
 0x246   : > { %1986 = vmatpush2.bf16.msra.mxu0 %v3084_v48 }
 0x247   : > { %2039 = vmatpush2.bf16.msra.mxu1 %v3087_v49  ;;  %1987 = vmatprep.subr.bf16.mxu0 %v3092_v50 }
 0x248   : > { %2040 = vmatprep.subr.bf16.mxu1 %v3095_v54 }
 0x24a   : > { %1988 = vmatpush2.bf16.msra.mxu0 %v3090_v55 }
 0x24b   : > { %2041 = vmatpush2.bf16.msra.mxu1 %v3093_v56  ;;  %1989 = vmatprep.subr.bf16.mxu0 %v3098_v57 }
 0x24c   : > { %2042 = vmatprep.subr.bf16.mxu1 %v3101_v58 }
 0x24e   : > { %1990 = vmatpush2.bf16.msra.mxu0 %v3096_v59 }
 0x24f   : > { %2043 = vmatpush2.bf16.msra.mxu1 %v3099_v62  ;;  %1991 = vmatprep.subr.bf16.mxu0 %v3104_v0 }
 0x250   : > { %2044 = vmatprep.subr.bf16.mxu1 %v3107_v1 }
 0x252   : > { %1992 = vmatpush2.bf16.msra.mxu0 %v3102_v2 }
 0x253   : > { %2045 = vmatpush2.bf16.msra.mxu1 %v3105_v4  ;;  %1993 = vmatprep.subr.bf16.mxu0 %v3110_v6 }
 0x254   : > { %2046 = vmatprep.subr.bf16.mxu1 %v3113_v7 }
 0x256   : > { %1994 = vmatpush2.bf16.msra.mxu0 %v3108_v25 }
 0x257   : > { %2047 = vmatpush2.bf16.msra.mxu1 %v3111_v29  ;;  %1995 = vmatprep.subr.bf16.mxu0 %v3116_v8 }
 0x258   : > { %2048 = vmatprep.subr.bf16.mxu1 %v3119_v9 }
 0x25a   : > { %1996 = vmatpush2.bf16.msra.mxu0 %v3114_v10 }
 0x25b   : > { %2049 = vmatpush2.bf16.msra.mxu1 %v3117_v11  ;;  %2773 = vmatprep.subr.bf16.mxu0 %v3120_v12 }
 0x25d   : > { %1998 = vmatmul.mubr.bf16.vlgmr.msra.gmra.mxu0 %v3717_v23  ;;  %v3127_v23 = vld [vmem:[#allocation11 + $0x20] sm:$0xff]  }
 0x25e   : > { %2051 = vmatmul.mubr.bf16.vlgmr.msra.gmra.mxu1 %v3719_v44  ;;  %2007 = vmatprep.mubr.bf16.mxu0 %v3737_v20  ;;  %v3128_v44 = vld [vmem:[#allocation11 + $0x58] sm:$0xff]   ;;  %v3132_v20 = vld [vmem:[#allocation11 + $0x48] sm:$0xff]  }
 0x25f   : > { %2060 = vmatprep.mubr.bf16.mxu1 %v3742_v52  ;;  %2774 = vmatpush3.bf16.msra.mxu0 %v3121_v53  ;;  %v3136_v52 = vld [vmem:[#allocation11 + $0xf8] sm:$0xff]  }
 0x260   : > { %2775 = vmatprep.subr.bf16.mxu0 %v3122_v13  ;;  %2801 = vmatprep.subr.bf16.mxu1 %v3136_v52 }
 0x261   : > { %2802 = vmatpush3.bf16.msra.mxu1 %v3137_v27  ;;  %v1214_v27 = vrot.slane %v1197_v42, %v3662_v26 }
 0x262   : > { %2803 = vmatprep.subr.bf16.mxu1 %v3138_v28  ;;  %v1210_v28 = vrot.slane %v1197_v42, %v3669_v24 }
 0x263   : > { %2776 = vmatpush3.bf16.msra.mxu0 %v3123_v14 }
 0x264   : > { %2777 = vmatprep.subr.bf16.mxu0 %v3124_v45 }
 0x265   : > { %2008 = vmatmul.mubr.bf16.gmra.mxu0 %v3739_v21  ;;  %v3135_v21 = vld [vmem:[#allocation11] sm:$0xff]   ;;  %2804 = vmatpush3.bf16.msra.mxu1 %v3139_v60 }
 0x266   : > { %2061 = vmatmul.mubr.bf16.gmra.mxu1 %v3748_v34  ;;  %2805 = vmatprep.subr.bf16.mxu1 %v3140_v39  ;;  %v3144_v34 = vld [vmem:[#allocation11 + $0xd8] sm:$0xff]  }
 0x267   : > { %2778 = vmatpush3.bf16.msra.mxu0 %v3125_v15 }
 0x268   : > { %2779 = vmatprep.subr.bf16.mxu0 %v3126_v16 }
 0x269   : > { %2806 = vmatpush3.bf16.msra.mxu1 %v3141_v30 }
 0x26a   : > { %2807 = vmatprep.subr.bf16.mxu1 %v3142_v31 }
 0x26b   : > { %2780 = vmatpush3.bf16.msra.mxu0 %v3127_v23 }
 0x26c   : > { %2781 = vmatprep.subr.bf16.mxu0 %v3128_v44 }
 0x26d   : > { %2808 = vmatpush3.bf16.msra.mxu1 %v3143_v32 }
 0x26e   : > { %2809 = vmatprep.subr.bf16.mxu1 %v3144_v34 }
 0x26f   : > { %2782 = vmatpush3.bf16.msra.mxu0 %v3129_v51 }
 0x270   : > { %2783 = vmatprep.subr.bf16.mxu0 %v3130_v33 }
 0x271   : > { %2810 = vmatpush3.bf16.msra.mxu1 %v3145_v63 }
 0x272   : > { %2811 = vmatprep.subr.bf16.mxu1 %v3146_v35 }
 0x273   : > { %2784 = vmatpush3.bf16.msra.mxu0 %v3131_v19 }
 0x274   : > { %2785 = vmatprep.subr.bf16.mxu0 %v3132_v20 }
 0x275   : > { %2812 = vmatpush3.bf16.msra.mxu1 %v3147_v36 }
 0x276   : > { %2813 = vmatprep.subr.bf16.mxu1 %v3148_v37 }
 0x277   : > { %2786 = vmatpush3.bf16.msra.mxu0 %v3133_v61 }
 0x278   : > { %2787 = vmatprep.subr.bf16.mxu0 %v3134_v22 }
 0x279   : > { %2814 = vmatpush3.bf16.msra.mxu1 %v3149_v38 }
 0x27a   : > { %2815 = vmatprep.subr.bf16.mxu1 %v3150_v40 }
 0x27b   : > { %2788 = vmatpush3.bf16.msra.mxu0 %v3135_v21 }
 0x27d   : > { %2816 = vmatpush3.bf16.msra.mxu1 %v3151_v41 }
 0x2dd   : > { %v1893_v3 = vpop.f32.mrf.mxu0 }
 0x2de   : > { %v1946_v47 = vpop.f32.mrf.mxu1  ;;  %v1894_v50 = vadd.f32 %v1893_v3, %v1202_v46 }
 0x2df   : > { %v1895_v5 = vpop.f32.mrf.mxu0 }
 0x2e0   : > { %v1948_v48 = vpop.f32.mrf.mxu1  ;;  %v1896_v49 = vadd.f32 %v1895_v5, %v1206_v43  ;;  %v1947_v0 = vadd.f32 %v1946_v47, %v1894_v50 }
 0x2e1   : > { %v1897_v54 = vpop.f32.mrf.mxu0 }
 0x2e2   : > { %v1950_v55 = vpop.f32.mrf.mxu1  ;;  %v1898_v56 = vadd.f32 %v1897_v54, %v1202_v46  ;;  %v1949_v58 = vadd.f32 %v1948_v48, %v1896_v49  ;;  %v2071_v18 = vmax.f32 %v1947_v0, 0.0 }
 0x2e3   : > { %v1899_v57 = vpop.f32.mrf.mxu0 }
 0x2e4   : > { %v1951_v59 = vadd.f32 %v1950_v55, %v1898_v56  ;;  %v1900_v62 = vadd.f32 %v1899_v57, %v1206_v43  ;;  %v1952_v1 = vpop.f32.mrf.mxu1  ;;  %v2072_v17 = vmax.f32 %v1949_v58, 0.0 }
 0x2e5   : > { %v1903_v29 = vpop.f32.mrf.mxu0 }
 0x2e6   : > { %v1953_v2 = vadd.f32 %v1952_v1, %v1900_v62  ;;  %v2075_v4 = vmax.f32 %v1951_v59, 0.0  ;;  %v1904_v8 = vadd.f32 %v1903_v29, %v1202_v46  ;;  %v1956_v11 = vpop.f32.mrf.mxu1 }
 0x2e7   : > { %v1905_v9 = vpop.f32.mrf.mxu0 }
 0x2e8   : > { %v2076_v6 = vmax.f32 %v1953_v2, 0.0  ;;  %v2087_v25 = vpack.c.bf16 %v2075_v4, %v2071_v18  ;;  %v1906_v10 = vadd.f32 %v1905_v9, %v1206_v43  ;;  %v1957_v53 = vadd.f32 %v1956_v11, %v1904_v8  ;;  %v1958_v14 = vpop.f32.mrf.mxu1 }
 0x2e9   : > { %v1907_v12 = vpop.f32.mrf.mxu0 }
 0x2ea   : > { %v2088_v7 = vpack.c.bf16 %v2076_v6, %v2072_v17  ;;  %v1908_v13 = vadd.f32 %v1907_v12, %v1202_v46  ;;  %v1959_v45 = vadd.f32 %v1958_v14, %v1906_v10  ;;  %v1960_v23 = vpop.f32.mrf.mxu1  ;;  %v2079_v51 = vmax.f32 %v1957_v53, 0.0 }
 0x2eb   : > { %v1909_v15 = vpop.f32.mrf.mxu0 }
 0x2ec   : > { %2390 = vmatprep.mubr.bf16.mxu0 %v2088_v7  ;;  %v1910_v16 = vadd.f32 %v1909_v15, %v1206_v43  ;;  %v1961_v44 = vadd.f32 %v1960_v23, %v1908_v13  ;;  %v1962_v33 = vpop.f32.mrf.mxu1  ;;  %v2080_v19 = vmax.f32 %v1959_v45, 0.0  ;;  %v2733_v15 = vld [vmem:[%s3804_s7] ss:$0 sm:$0xff] }
 0x2ed   : > { %2391 = vmatmul.mubr.bf16.vlgmr.msra.gmra.mxu0 %v2087_v25 }
 0x2ee   : > { %v2083_v20 = vmax.f32 %v1961_v44, 0.0  ;;  %v1963_v61 = vadd.f32 %v1962_v33, %v1910_v16 }
 0x2f0   : > { %v2084_v22 = vmax.f32 %v1963_v61, 0.0  ;;  %v2091_v21 = vpack.c.bf16 %v2083_v20, %v2079_v51 }
 0x2f2   : > { %v2092_v52 = vpack.c.bf16 %v2084_v22, %v2080_v19 }
 0x2f4   : > { %2398 = vmatprep.mubr.bf16.mxu0 %v2092_v52  ;;  %v2766_v52 = vld [vmem:[%s3805_s8] ss:$0 sm:$0xff] }
 0x2f5   : > { %2399 = vmatmul.mubr.bf16.gmra.mxu0 %v2091_v21 }
 0x31d   : > { %v1999_v60 = vpop.f32.mrf.mxu0 }
 0x31e   : > { %v2052_v39 = vpop.f32.mrf.mxu1  ;;  %v2000_v34 = vadd.f32 %v1999_v60, %v1210_v28 }
 0x31f   : > { %v2001_v30 = vpop.f32.mrf.mxu0 }
 0x320   : > { %v2054_v31 = vpop.f32.mrf.mxu1  ;;  %v2002_v32 = vadd.f32 %v2001_v30, %v1214_v27  ;;  %v2053_v46 = vadd.f32 %v2052_v39, %v2000_v34 }
 0x321   : > { %v2003_v63 = vpop.f32.mrf.mxu0 }
 0x322   : > { %v2056_v35 = vpop.f32.mrf.mxu1  ;;  %v2004_v36 = vadd.f32 %v2003_v63, %v1210_v28  ;;  %v2055_v40 = vadd.f32 %v2054_v31, %v2002_v32  ;;  %v2073_v54 = vmax.f32 %v2053_v46, 0.0 }
 0x323   : > { %v2005_v37 = vpop.f32.mrf.mxu0 }
 0x324   : > { %v2058_v38 = vpop.f32.mrf.mxu1  ;;  %v2057_v41 = vadd.f32 %v2056_v35, %v2004_v36  ;;  %v2006_v43 = vadd.f32 %v2005_v37, %v1214_v27  ;;  %v2074_v48 = vmax.f32 %v2055_v40, 0.0 }
 0x325   : > { %v2009_v3 = vpop.f32.mrf.mxu0 }
 0x326   : > { %v2062_v47 = vpop.f32.mrf.mxu1  ;;  %v2059_v26 = vadd.f32 %v2058_v38, %v2006_v43  ;;  %v2077_v5 = vmax.f32 %v2057_v41, 0.0  ;;  %v2010_v55 = vadd.f32 %v2009_v3, %v1210_v28 }
 0x327   : > { %v2011_v24 = vpop.f32.mrf.mxu0 }
 0x328   : > { %v2064_v42 = vpop.f32.mrf.mxu1  ;;  %v2078_v49 = vmax.f32 %v2059_v26, 0.0  ;;  %v2012_v50 = vadd.f32 %v2011_v24, %v1214_v27  ;;  %v2089_v62 = vpack.c.bf16 %v2077_v5, %v2073_v54  ;;  %v2063_v17 = vadd.f32 %v2062_v47, %v2010_v55 }
 0x329   : > { %v2013_v56 = vpop.f32.mrf.mxu0 }
 0x32a   : > { %v2066_v57 = vpop.f32.mrf.mxu1  ;;  %v2090_v58 = vpack.c.bf16 %v2078_v49, %v2074_v48  ;;  %v2014_v59 = vadd.f32 %v2013_v56, %v1210_v28  ;;  %v2065_v1 = vadd.f32 %v2064_v42, %v2012_v50  ;;  %v2081_v8 = vmax.f32 %v2063_v17, 0.0  ;;  %v2767_v49 = vld [vmem:[#allocation3] ss:$0 sm:$0xff] }
 0x32b   : > { %v2015_v0 = vpop.f32.mrf.mxu0 }
 0x32c   : > { %v2067_v2 = vadd.f32 %v2066_v57, %v2014_v59  ;;  %v2016_v4 = vadd.f32 %v2015_v0, %v1214_v27  ;;  %2439 = vmatprep.mubr.bf16.mxu1 %v2090_v58  ;;  %v2068_v6 = vpop.f32.mrf.mxu1  ;;  %v2082_v25 = vmax.f32 %v2065_v1, 0.0 }
 0x32d   : > { %2440 = vmatmul.mubr.bf16.vlgmr.msra.gmra.mxu1 %v2089_v62 }
 0x32e   : > { %v2069_v18 = vadd.f32 %v2068_v6, %v2016_v4  ;;  %v2085_v7 = vmax.f32 %v2067_v2, 0.0 }
 0x330   : > { %v2086_v29 = vmax.f32 %v2069_v18, 0.0  ;;  %v2093_v10 = vpack.c.bf16 %v2085_v7, %v2081_v8 }
 0x332   : > { %v2094_v9 = vpack.c.bf16 %v2086_v29, %v2082_v25 }
 0x334   : > { %2447 = vmatprep.mubr.bf16.mxu1 %v2094_v9 }
 0x335   : > { %2448 = vmatmul.mubr.bf16.gmra.mxu1 %v2093_v10 }
 0x3ad   : > { %v2789_v11 = vpop.f32.mrf.mxu0 }
 0x3af   : > { %v2790_v12 = vpop.f32.mrf.mxu0 }
 0x3b0   : > { %v2791_v45 = vadd.f32 %v2790_v12, %v2789_v11 }
 0x3b1   : > { %v2792_v53 = vpop.f32.mrf.mxu0 }
 0x3b2   : > { %v2393_v51 = vadd.f32 %v2791_v45, %v2733_v15 }
 0x3b3   : > { %v2793_v13 = vpop.f32.mrf.mxu0 }
 0x3b4   : > { %v2794_v33 = vadd.f32 %v2793_v13, %v2792_v53 }
 0x3b5   : > { %v2795_v14 = vpop.f32.mrf.mxu0 }
 0x3b6   : > { %v2396_v27 = vadd.f32 %v2794_v33, %v2733_v15 }
 0x3b7   : > { %v2796_v16 = vpop.f32.mrf.mxu0 }
 0x3b8   : > { %v2797_v28 = vadd.f32 %v2796_v16, %v2795_v14 }
 0x3b9   : > { %v2798_v20 = vpop.f32.mrf.mxu0 }
 0x3ba   : > { %v2401_v35 = vadd.f32 %v2797_v28, %v2733_v15 }
 0x3bb   : > { %v2799_v30 = vpop.f32.mrf.mxu0 }
 0x3bc   : > { %v2800_v36 = vadd.f32 %v2799_v30, %v2798_v20 }
 0x3be   : > { %v2404_v3 = vadd.f32 %v2800_v36, %v2733_v15 }
 0x3ed   : > { %v2817_v23 = vpop.f32.mrf.mxu1 }
 0x3ef   : > { %v2818_v44 = vpop.f32.mrf.mxu1 }
 0x3f0   : > { %v2819_v19 = vadd.f32 %v2818_v44, %v2817_v23 }
 0x3f1   : > { %v2820_v61 = vpop.f32.mrf.mxu1 }
 0x3f2   : > { %v2442_v22 = vadd.f32 %v2819_v19, %v2393_v51 }
 0x3f3   : > { %v2821_v21 = vpop.f32.mrf.mxu1 }
 0x3f4   : > { %v2822_v60 = vadd.f32 %v2821_v21, %v2820_v61  ;;  %v2456_v39 = vmax.f32 %v2442_v22, 0.0 }
 0x3f5   : > { %v2823_v31 = vpop.f32.mrf.mxu1 }
 0x3f6   : > { %v2445_v32 = vadd.f32 %v2822_v60, %v2396_v27  ;;  %v2467_v34 = vmul.f32 %v2766_v52, %v2456_v39 }
 0x3f7   : > { %v2824_v63 = vpop.f32.mrf.mxu1 }
 0x3f8   : > { %v2457_v37 = vmax.f32 %v2445_v32, 0.0  ;;  %v2825_v38 = vadd.f32 %v2824_v63, %v2823_v31  ;;  %2471 = vadd.xlane.f32.xlu0 %v2467_v34 }
 0x3f9   : > { %v2826_v40 = vpop.f32.mrf.mxu1 }
 0x3fa   : > { %v2468_v41 = vmul.f32 %v2766_v52, %v2457_v37  ;;  %v2450_v43 = vadd.f32 %v2825_v38, %v2401_v35 }
 0x3fb   : > { %v2827_v46 = vpop.f32.mrf.mxu1 }
 0x3fc   : > { %v2828_v47 = vadd.f32 %v2827_v46, %v2826_v40  ;;  %2473 = vadd.xlane.f32.xlu0 %v2468_v41  ;;  %v2458_v26 = vmax.f32 %v2450_v43, 0.0 }
 0x3fe   : > { %v2453_v5 = vadd.f32 %v2828_v47, %v2404_v3  ;;  %v2469_v24 = vmul.f32 %v2766_v52, %v2458_v26 }
 0x400   : > { %v2459_v42 = vmax.f32 %v2453_v5, 0.0  ;;  %2475 = vadd.xlane.f32.xlu1 %v2469_v24 }
 0x402   : > { %v2470_v48 = vmul.f32 %v2766_v52, %v2459_v42 }
 0x404   : > { %2477 = vadd.xlane.f32.xlu1 %v2470_v48 }
 0x481   : > { %v2472_v50 = vpop.xlane.xlu0 %2471 }
 0x482   : > { %v2486_v54 = vadd.f32 %v2767_v49, %v2472_v50 }
 0x484   : > { %2491 = vst.msk [vmem:[%s3807_s10] sm:$0xff] %vm2490_vm0, %v2486_v54 }
 0x485   : > { %v2474_v55 = vpop.xlane.xlu0 %2473 }
 0x486   : > { %v2487_v56 = vadd.f32 %v2767_v49, %v2474_v55 }
 0x488   : > { %2492 = vst.msk [vmem:[%s3807_s10 + $0x8] sm:$0xff] %vm2490_vm0, %v2487_v56 }
 0x489   : > { %v2476_v57 = vpop.xlane.xlu1 %2475 }
 0x48a   : > { %v2488_v58 = vadd.f32 %v2767_v49, %v2476_v57 }
 0x48c   : > { %2493 = vst.msk [vmem:[%s3807_s10 + $0x10] sm:$0xff] %vm2490_vm0, %v2488_v58 }
 0x48d   : > { %v2478_v59 = vpop.xlane.xlu1 %2477 }
 0x48e   : > { %v2489_v62 = vadd.f32 %v2767_v49, %v2478_v59 }
 0x490   : > { %2494 = vst.msk [vmem:[%s3807_s10 + $0x18] sm:$0xff] %vm2490_vm0, %v2489_v62 }
 0x491 PF: > { %s3824_s20 = smov %s3490_s15  ;;  %p24_p2 = scmp.ge.s32.totalorder %s3481_s12, 6  }
 0x492   : > { %s3825_s15 = smov %s3322_s16  ;;  %s3826_s16 = smov %s3326_s17 }
 0x493   : > { %s3827_s17 = smov %s3824_s20  ;;  %s3828_s18 = smov %s3481_s12 }
 0x494   :  { %26 = sbr.rel (!%p24_p2) target bundleno = 8 (0x8), region = 122 }
 0x499   :  { %2506 = vsyncpa [#allocation5], 1 }
 0x49a   :  { %2508 = vsyncpa [#allocation5 + $0x1], 1 }
 0x49b   :  { %2509 = vsyncpa [#allocation7], 1 }
 0x49c   :  { %2511 = vsyncpa [#allocation7 + $0x1], 1 }
 0x49d   :  { %2512 = vsyncpa [#allocation10], 1 }

</bundles_post_ra>
